<compile_context>
chip_gen: v6e
topology: v6e:2x2x1
jax: 0.10.0
libtpu: 0.0.40
codegen_flags: <defaults>
</compile_context>

<pallas_src>
import functools

import jax
import jax.numpy as jnp
from jax.experimental import pallas as pl
from jax.experimental.pallas import tpu as pltpu

_VMEM = pl.BlockSpec(memory_space=pltpu.MemorySpace.VMEM)
_NEG = -1e30  # pre-max mask for invalid (position, channel) slots; ReLU maps it to 0


# ---------------------------------------------------------------------------
# Fused Pallas kernel: embedding (one-hot matmul) + conv (banded matmul) +
# bias/ReLU + max-pool + fc, all lane/sublane aligned.
# ---------------------------------------------------------------------------
def fused_cnn_kernel(tok_ref, ebig_ref, wband_ref, bm_ref, fcw_ref, fcb_ref, o_ref, *,
                     sents, bpad, seq_len, vpad, n_pos, fpad):
    """Whole forward in one kernel.

    tok_ref  : [S*BPAD, L]         int32 token ids, rows sentence-major (s*BPAD + b)
    ebig_ref : [L*VPAD, L*D]       block-diagonal embedding (one vocab block per position)
    wband_ref: [L*D, n_pos*FPAD]   banded conv weights, position-major 128-lane groups
    bm_ref   : [1, n_pos*FPAD]     conv bias where (pos, channel) valid, -1e30 elsewhere
    fcw_ref  : [S, FPAD, CPAD]     fc weight per sentence, zero-padded to 128 lanes
    fcb_ref  : [1, CPAD]           fc bias, zero-padded to 128 lanes
    o_ref    : [BPAD, CPAD]        padded logits (wrapper slices [:B, :C])
    """
    nrows = sents * bpad

    # 1) Embedding lookup as a one-hot MXU matmul.  The one-hot is built with
    #    whole-vreg lane-iota compares, one 128-lane group per token position.
    lane_iota = jax.lax.broadcasted_iota(jnp.int32, (nrows, vpad), 1)
    onehot = jnp.concatenate(
        [(tok_ref[:, p:p + 1] == lane_iota).astype(jnp.float32) for p in range(seq_len)],
        axis=1)                                                      # [NROWS, L*VPAD]
    x = jnp.dot(onehot, ebig_ref[...],
                preferred_element_type=jnp.float32)                  # [NROWS, L*D]

    # 2) All conv filters & all window positions in ONE banded MXU matmul.
    scores = jnp.dot(x, wband_ref[...],
                     preferred_element_type=jnp.float32)             # [NROWS, n_pos*FPAD]

    # 3) Conv bias + ReLU as one whole-vreg op (matches torch order: relu before pool;
    #    invalid (pos, channel) slots carry -1e30 -> relu -> 0).
    z = jnp.maximum(scores + bm_ref[...], 0.0)

    # 4) Global max-pool over positions: chained whole-vreg maxima over
    #    128-lane-aligned position groups (VPU only, zero cross-lane movement).
    pooled = z[:, 0:fpad]
    for t in range(1, n_pos):
        pooled = jnp.maximum(pooled, z[:, t * fpad:(t + 1) * fpad])  # [NROWS, FPAD]

    # 5) FC as a single batched contraction over sentences.  Each sentence block is
    #    a full 8-sublane tile, so the reshape is a free re-tile.
    feats3 = pooled.reshape(sents, bpad, fpad)                       # [S, BPAD, FPAD]
    prod = jnp.einsum('sbf,sfc->sbc', feats3, fcw_ref[...],
                      preferred_element_type=jnp.float32)            # [S, BPAD, CPAD]
    o_ref[...] = jnp.sum(prod, axis=0) + fcb_ref[...]                # lane-dense [8,128] store


# ---------------------------------------------------------------------------
# One-time host-side parameter prep (banded/padded layouts)
# ---------------------------------------------------------------------------
def prepare_fused_params(params, *, filters, filter_num, word_dim, max_sent_len,
                         sentence_num, class_size, vocab_size, batch_size):
    L, D, V = max_sent_len, word_dim, vocab_size
    FPAD = 128                        # lanes per position channel group
    CPAD = 128                        # lane-padded class dim
    VPAD = 128                        # lane-padded vocab block for the one-hot matmul
    BPAD = ((batch_size + 7) // 8) * 8
    # TODO(synk): for realistic vocab sizes the one-hot matmul is O(vocab); switch to a
    #             DMA gather (scalar-prefetch token ids + make_async_copy from HBM).
    assert V <= VPAD
    sum_fn = sum(filter_num)
    assert sum_fn <= FPAD
    n_pos_max = max(L - f + 1 for f in filters)

    coffs, off = [], 0
    for fn in filter_num:
        coffs.append(off)
        off += fn

    # Banded conv weight + per-position bias/mask, position-major 128-lane groups.
    # TODO(synk): at realistic L/D/Fn this banded weight scales O(L^2*D*Fn) and will
    #             overflow v7x's 64 MiB VMEM; switch to activation-side im2col or tile
    #             the position axis with a grid + vmem_limit_bytes.
    w_band = jnp.zeros((L * D, n_pos_max * FPAD), jnp.float32)
    bm = jnp.full((1, n_pos_max * FPAD), _NEG, jnp.float32)
    for i, f in enumerate(filters):
        w = params[f"conv_w_{i}"]                  # [f*D, Fn] (torch [Fn,1,f*D] transposed)
        b = params[f"conv_b_{i}"]                  # [1, Fn]
        fn = filter_num[i]
        for t in range(L - f + 1):                 # valid conv positions
            c0 = t * FPAD + coffs[i]
            w_band = w_band.at[t * D:(t + f) * D, c0:c0 + fn].set(w)
            bm = bm.at[:, c0:c0 + fn].set(b)

    # Block-diagonal embedding for the in-kernel one-hot matmul.
    ebig = jnp.zeros((L * VPAD, L * D), jnp.float32)
    for p in range(L):
        ebig = ebig.at[p * VPAD:p * VPAD + V, p * D:(p + 1) * D].set(params["embedding"])

    # fc weight [S*sum_fn, C] -> [S, FPAD, CPAD] zero-padded; fc bias -> [1, CPAD].
    fc_w3 = params["fc_w"].reshape(sentence_num, sum_fn, class_size)
    fcw_pad = jnp.zeros((sentence_num, FPAD, CPAD), jnp.float32)
    fcw_pad = fcw_pad.at[:, :sum_fn, :class_size].set(fc_w3)
    fcb_pad = jnp.zeros((1, CPAD), jnp.float32).at[:, :class_size].set(params["fc_b"])

    fused = dict(ebig=ebig, w_band=w_band, bm=bm, fcw=fcw_pad, fcb=fcb_pad)
    dims = dict(S=sentence_num, L=L, D=D, VPAD=VPAD, FPAD=FPAD, CPAD=CPAD,
                BPAD=BPAD, NPOS=n_pos_max, C=class_size)
    return fused, dims


# ---------------------------------------------------------------------------
# Forward: tiny int32 row-shuffle in JAX, everything else in the fused kernel
# ---------------------------------------------------------------------------
def cnn_forward(tokens, fused, dims):
    """tokens: int32 [batch, sentence_num, max_sent_len]."""
    B, S, L = tokens.shape
    BPAD = dims["BPAD"]
    assert S == dims["S"] and L == dims["L"] and B <= BPAD

    # Sentence-major rows, batch padded to 8 sublanes per sentence (row = s*BPAD + b).
    # This shuffles a few hundred bytes of int32; all heavy work is in-kernel.
    tok_sm = jnp.transpose(tokens, (1, 0, 2)).astype(jnp.int32)                 # [S, B, L]
    tok_rows = (jnp.zeros((S, BPAD, L), jnp.int32).at[:, :B, :].set(tok_sm)
                .reshape(S * BPAD, L))

    kern = functools.partial(fused_cnn_kernel, sents=S, bpad=BPAD, seq_len=L,
                             vpad=dims["VPAD"], n_pos=dims["NPOS"], fpad=dims["FPAD"])
    # TODO(synk): when batch*sentence_num grows, add a leading 'parallel' grid axis over
    #             256-row blocks (dimension_semantics=('parallel',)) to use both v7x
    #             TensorCores, and cast the MXU inputs to bf16 on v6e/v7x (keep f32
    #             accumulation and f32 VPU post-processing, esp. on v5e).
    out_pad = pl.pallas_call(
        kern,
        out_shape=jax.ShapeDtypeStruct((BPAD, dims["CPAD"]), jnp.float32),
        in_specs=[_VMEM] * 6,
        out_specs=_VMEM,
    )(tok_rows, fused["ebig"], fused["w_band"], fused["bm"], fused["fcw"], fused["fcb"])
    return out_pad[:B, :dims["C"]]


# ---------------------------------------------------------------------------
# Pure-jnp reference mirroring the PyTorch forward semantics
# ---------------------------------------------------------------------------
def reference_forward(tokens, params, *, filters, word_dim):
    B, S, L = tokens.shape
    emb = jnp.take(params["embedding"], tokens, axis=0)            # [B, S, L, D]
    sent_feats = []
    for s in range(S):
        flat = emb[:, s].reshape(B, L * word_dim)
        convs = []
        for i, f in enumerate(filters):
            n_pos = L - f + 1
            outs = []
            for t in range(n_pos):
                win = flat[:, t * word_dim:(t + f) * word_dim]
                outs.append(jnp.maximum(
                    win @ params[f"conv_w_{i}"] + params[f"conv_b_{i}"], 0.0))
            convs.append(jnp.max(jnp.stack(outs, axis=1), axis=1))
        sent_feats.append(jnp.concatenate(convs, axis=1))
    x = jnp.concatenate(sent_feats, axis=1)                        # [B, S*sumFn]
    # F.dropout(training=False) is identity at inference time.
    return x @ params["fc_w"] + params["fc_b"]


# ---------------------------------------------------------------------------
if __name__ == "__main__":
    # Hyper-parameters implied by the module (small, synthetic).
    # TODO(synk): 'multichannel' model (second embedding / in_channel=2) not implemented;
    #             this covers model='rand' (in_channel=1), inference mode.
    batch_size = 2
    sentence_num = 3
    max_sent_len = 8
    word_dim = 16
    vocab_size = 50
    class_size = 5
    filters = [2, 3]
    filter_num = [8, 16]

    key = jax.random.PRNGKey(0)
    k_emb, k_tok, k_fc_w, k_fc_b, *k_conv = jax.random.split(key, 4 + 2 * len(filters))

    params = {}
    emb = 0.1 * jax.random.normal(k_emb, (vocab_size, word_dim), jnp.float32)
    emb = emb.at[0].set(0.0)  # padding_idx = 0
    params["embedding"] = emb
    for i, f in enumerate(filters):
        kw, kb = k_conv[2 * i], k_conv[2 * i + 1]
        # torch Conv1d weight [Fn, in_channel=1, f*word_dim] -> stored as [f*word_dim, Fn]
        params[f"conv_w_{i}"] = 0.1 * jax.random.normal(
            kw, (f * word_dim, filter_num[i]), jnp.float32)
        params[f"conv_b_{i}"] = 0.1 * jax.random.normal(kb, (1, filter_num[i]), jnp.float32)
    fc_in = sentence_num * sum(filter_num)
    params["fc_w"] = 0.1 * jax.random.normal(k_fc_w, (fc_in, class_size), jnp.float32)
    params["fc_b"] = 0.1 * jax.random.normal(k_fc_b, (1, class_size), jnp.float32)

    tokens = jax.random.randint(
        k_tok, (batch_size, sentence_num, max_sent_len), 0, vocab_size, dtype=jnp.int32)

    # One-time prep (banded conv weight, block-diagonal embedding, padded fc), then forward.
    fused, dims = prepare_fused_params(
        params, filters=filters, filter_num=filter_num, word_dim=word_dim,
        max_sent_len=max_sent_len, sentence_num=sentence_num, class_size=class_size,
        vocab_size=vocab_size, batch_size=batch_size)

    fwd = jax.jit(lambda toks, fp: cnn_forward(toks, fp, dims))
    out = jax.block_until_ready(fwd(tokens, fused))

    ref = reference_forward(tokens, params, filters=filters, word_dim=word_dim)
    assert out.shape == (batch_size, class_size)
    # Relaxed tolerance: kernel routes the embedding lookup and conv through default-
    # precision MXU matmuls, while the reference uses an exact f32 gather + many small
    # XLA dots; structural bugs would produce errors orders of magnitude larger.
    assert jnp.allclose(out, ref, atol=5e-3, rtol=5e-3), "Pallas output mismatch vs reference"

    print("KERNEL_OK")
</pallas_src>

<mosaic_0001>
module attributes {stable_mosaic.version = 11 : i64} {
  func.func @fused_cnn_kernel(%arg0: memref<24x8xi32, #tpu.memory_space<vmem>>, %arg1: memref<1024x128xf32, #tpu.memory_space<vmem>>, %arg2: memref<128x896xf32, #tpu.memory_space<vmem>>, %arg3: memref<1x896xf32, #tpu.memory_space<vmem>>, %arg4: memref<3x128x128xf32, #tpu.memory_space<vmem>>, %arg5: memref<1x128xf32, #tpu.memory_space<vmem>>, %arg6: memref<8x128xf32, #tpu.memory_space<vmem>>) attributes {dimension_semantics = [], scalar_prefetch = 0 : i64, scratch_operands = 0 : i64, tpu.core_type = #tpu.core_type<tc>} {
    %0 = tpu.iota {dimensions = array<i32: 1>} : vector<24x128xi32>
    %c0 = arith.constant 0 : index
    %c0_0 = arith.constant 0 : index
    %1 = vector.load %arg0[%c0, %c0_0] : memref<24x8xi32, #tpu.memory_space<vmem>>, vector<24x1xi32>
    %2 = vector.broadcast %1 : vector<24x1xi32> to vector<24x128xi32>
    %3 = arith.cmpi eq, %2, %0 : vector<24x128xi32>
    %4 = arith.extui %3 : vector<24x128xi1> to vector<24x128xi32>
    %5 = arith.sitofp %4 : vector<24x128xi32> to vector<24x128xf32>
    %c0_1 = arith.constant 0 : index
    %c1 = arith.constant 1 : index
    %6 = vector.load %arg0[%c0_1, %c1] : memref<24x8xi32, #tpu.memory_space<vmem>>, vector<24x1xi32>
    %7 = vector.broadcast %6 : vector<24x1xi32> to vector<24x128xi32>
    %8 = arith.cmpi eq, %7, %0 : vector<24x128xi32>
    %9 = arith.extui %8 : vector<24x128xi1> to vector<24x128xi32>
    %10 = arith.sitofp %9 : vector<24x128xi32> to vector<24x128xf32>
    %c0_2 = arith.constant 0 : index
    %c2 = arith.constant 2 : index
    %11 = vector.load %arg0[%c0_2, %c2] : memref<24x8xi32, #tpu.memory_space<vmem>>, vector<24x1xi32>
    %12 = vector.broadcast %11 : vector<24x1xi32> to vector<24x128xi32>
    %13 = arith.cmpi eq, %12, %0 : vector<24x128xi32>
    %14 = arith.extui %13 : vector<24x128xi1> to vector<24x128xi32>
    %15 = arith.sitofp %14 : vector<24x128xi32> to vector<24x128xf32>
    %c0_3 = arith.constant 0 : index
    %c3 = arith.constant 3 : index
    %16 = vector.load %arg0[%c0_3, %c3] : memref<24x8xi32, #tpu.memory_space<vmem>>, vector<24x1xi32>
    %17 = vector.broadcast %16 : vector<24x1xi32> to vector<24x128xi32>
    %18 = arith.cmpi eq, %17, %0 : vector<24x128xi32>
    %19 = arith.extui %18 : vector<24x128xi1> to vector<24x128xi32>
    %20 = arith.sitofp %19 : vector<24x128xi32> to vector<24x128xf32>
    %c0_4 = arith.constant 0 : index
    %c4 = arith.constant 4 : index
    %21 = vector.load %arg0[%c0_4, %c4] : memref<24x8xi32, #tpu.memory_space<vmem>>, vector<24x1xi32>
    %22 = vector.broadcast %21 : vector<24x1xi32> to vector<24x128xi32>
    %23 = arith.cmpi eq, %22, %0 : vector<24x128xi32>
    %24 = arith.extui %23 : vector<24x128xi1> to vector<24x128xi32>
    %25 = arith.sitofp %24 : vector<24x128xi32> to vector<24x128xf32>
    %c0_5 = arith.constant 0 : index
    %c5 = arith.constant 5 : index
    %26 = vector.load %arg0[%c0_5, %c5] : memref<24x8xi32, #tpu.memory_space<vmem>>, vector<24x1xi32>
    %27 = vector.broadcast %26 : vector<24x1xi32> to vector<24x128xi32>
    %28 = arith.cmpi eq, %27, %0 : vector<24x128xi32>
    %29 = arith.extui %28 : vector<24x128xi1> to vector<24x128xi32>
    %30 = arith.sitofp %29 : vector<24x128xi32> to vector<24x128xf32>
    %c0_6 = arith.constant 0 : index
    %c6 = arith.constant 6 : index
    %31 = vector.load %arg0[%c0_6, %c6] : memref<24x8xi32, #tpu.memory_space<vmem>>, vector<24x1xi32>
    %32 = vector.broadcast %31 : vector<24x1xi32> to vector<24x128xi32>
    %33 = arith.cmpi eq, %32, %0 : vector<24x128xi32>
    %34 = arith.extui %33 : vector<24x128xi1> to vector<24x128xi32>
    %35 = arith.sitofp %34 : vector<24x128xi32> to vector<24x128xf32>
    %c0_7 = arith.constant 0 : index
    %c7 = arith.constant 7 : index
    %36 = vector.load %arg0[%c0_7, %c7] : memref<24x8xi32, #tpu.memory_space<vmem>>, vector<24x1xi32>
    %37 = vector.broadcast %36 : vector<24x1xi32> to vector<24x128xi32>
    %38 = arith.cmpi eq, %37, %0 : vector<24x128xi32>
    %39 = arith.extui %38 : vector<24x128xi1> to vector<24x128xi32>
    %40 = arith.sitofp %39 : vector<24x128xi32> to vector<24x128xf32>
    %41 = tpu.concatenate %5, %10, %15, %20, %25, %30, %35, %40 in 1 : vector<24x128xf32>, vector<24x128xf32>, vector<24x128xf32>, vector<24x128xf32>, vector<24x128xf32>, vector<24x128xf32>, vector<24x128xf32>, vector<24x128xf32> -> vector<24x1024xf32>
    %c0_8 = arith.constant 0 : index
    %c0_9 = arith.constant 0 : index
    %42 = vector.load %arg1[%c0_8, %c0_9] : memref<1024x128xf32, #tpu.memory_space<vmem>>, vector<1024x128xf32>
    %cst = arith.constant dense<0.000000e+00> : vector<24x128xf32>
    %43 = tpu.matmul %41, %42, %cst {dimension_numbers = #tpu.dot_dimension_numbers<[1], [0], [0], [1], [0, 0, 1, 1], [], []>} : vector<24x1024xf32>, vector<1024x128xf32>, vector<24x128xf32> -> vector<24x128xf32>
    %c0_10 = arith.constant 0 : index
    %c0_11 = arith.constant 0 : index
    %44 = vector.load %arg2[%c0_10, %c0_11] : memref<128x896xf32, #tpu.memory_space<vmem>>, vector<128x896xf32>
    %cst_12 = arith.constant dense<0.000000e+00> : vector<24x896xf32>
    %45 = tpu.matmul %43, %44, %cst_12 {dimension_numbers = #tpu.dot_dimension_numbers<[1], [0], [0], [1], [0, 0, 1, 1], [], []>} : vector<24x128xf32>, vector<128x896xf32>, vector<24x896xf32> -> vector<24x896xf32>
    %c0_13 = arith.constant 0 : index
    %c0_14 = arith.constant 0 : index
    %46 = vector.load %arg3[%c0_13, %c0_14] : memref<1x896xf32, #tpu.memory_space<vmem>>, vector<1x896xf32>
    %47 = vector.broadcast %46 : vector<1x896xf32> to vector<24x896xf32>
    %48 = arith.addf %45, %47 : vector<24x896xf32>
    %cst_15 = arith.constant 0.000000e+00 : f32
    %49 = vector.broadcast %cst_15 : f32 to vector<24x896xf32>
    %50 = arith.maximumf %48, %49 : vector<24x896xf32>
    %51 = vector.extract_strided_slice %50 {offsets = [0, 0], sizes = [24, 128], strides = [1, 1]} : vector<24x896xf32> to vector<24x128xf32>
    %52 = vector.extract_strided_slice %50 {offsets = [0, 128], sizes = [24, 128], strides = [1, 1]} : vector<24x896xf32> to vector<24x128xf32>
    %53 = arith.maximumf %51, %52 : vector<24x128xf32>
    %54 = vector.extract_strided_slice %50 {offsets = [0, 256], sizes = [24, 128], strides = [1, 1]} : vector<24x896xf32> to vector<24x128xf32>
    %55 = arith.maximumf %53, %54 : vector<24x128xf32>
    %56 = vector.extract_strided_slice %50 {offsets = [0, 384], sizes = [24, 128], strides = [1, 1]} : vector<24x896xf32> to vector<24x128xf32>
    %57 = arith.maximumf %55, %56 : vector<24x128xf32>
    %58 = vector.extract_strided_slice %50 {offsets = [0, 512], sizes = [24, 128], strides = [1, 1]} : vector<24x896xf32> to vector<24x128xf32>
    %59 = arith.maximumf %57, %58 : vector<24x128xf32>
    %60 = vector.extract_strided_slice %50 {offsets = [0, 640], sizes = [24, 128], strides = [1, 1]} : vector<24x896xf32> to vector<24x128xf32>
    %61 = arith.maximumf %59, %60 : vector<24x128xf32>
    %62 = vector.extract_strided_slice %50 {offsets = [0, 768], sizes = [24, 128], strides = [1, 1]} : vector<24x896xf32> to vector<24x128xf32>
    %63 = arith.maximumf %61, %62 : vector<24x128xf32>
    %64 = vector.shape_cast %63 : vector<24x128xf32> to vector<3x8x128xf32>
    %c0_16 = arith.constant 0 : index
    %c0_17 = arith.constant 0 : index
    %c0_18 = arith.constant 0 : index
    %65 = vector.load %arg4[%c0_16, %c0_17, %c0_18] : memref<3x128x128xf32, #tpu.memory_space<vmem>>, vector<3x128x128xf32>
    "tpu.trace_start"() <{level = 10 : i32, message = "sbf,sfc->sbc"}> : () -> ()
    %cst_19 = arith.constant dense<0.000000e+00> : vector<3x8x128xf32>
    %66 = tpu.matmul %64, %65, %cst_19 {dimension_numbers = #tpu.dot_dimension_numbers<[2], [1], [1], [2], [0, 0, 0, 1, 1, 2], [0], [0]>} : vector<3x8x128xf32>, vector<3x128x128xf32>, vector<3x8x128xf32> -> vector<3x8x128xf32>
    "tpu.trace_stop"() : () -> ()
    %cst_20 = arith.constant dense<0.000000e+00> : vector<8x128xf32>
    %67 = vector.multi_reduction <add>, %66, %cst_20 [0] : vector<3x8x128xf32> to vector<8x128xf32>
    %c0_21 = arith.constant 0 : index
    %c0_22 = arith.constant 0 : index
    %68 = vector.load %arg5[%c0_21, %c0_22] : memref<1x128xf32, #tpu.memory_space<vmem>>, vector<1x128xf32>
    %69 = vector.broadcast %68 : vector<1x128xf32> to vector<8x128xf32>
    %70 = arith.addf %67, %69 : vector<8x128xf32>
    %c0_23 = arith.constant 0 : index
    %c0_24 = arith.constant 0 : index
    %71 = vector.load %arg6[%c0_23, %c0_24] : memref<8x128xf32, #tpu.memory_space<vmem>>, vector<8x128xf32>
    tpu.vector_store %arg6[%c0_23, %c0_24], %70 {strides = array<i32>} : memref<8x128xf32, #tpu.memory_space<vmem>>, vector<8x128xf32>,
    return
  }
}

</mosaic_0001>

<bundles_post_ra>
// kernel: _lambda_.1
= control target key start
LH: loop header
LB: loop body
LE: loop exit
PB: predicated region body
PF: predicated region fallthrough
CT: control target
= control target key end

     0   :  { %11 = vsyncpa [#allocation3], 0  ;;  %s2325_s0 = inlined_call_operand.vmem [shape: s32[24,8], index: 0, kind: input, shape index: {}]   ;;  %s2326_s1 = inlined_call_operand.hbm [shape: f32[1024,128], index: 1, kind: input, shape index: {}]   ;;  %s2327_s2 = inlined_call_operand.hbm [shape: f32[128,896], index: 2, kind: input, shape index: {}]   ;;  %s2328_s3 = inlined_call_operand.vmem [shape: f32[1,896], index: 3, kind: input, shape index: {}]   ;;  %s2329_s4 = inlined_call_operand.hbm [shape: f32[3,128,128], index: 4, kind: input, shape index: {}]   ;;  %s2330_s5 = inlined_call_operand.vmem [shape: f32[1,128], index: 5, kind: input, shape index: {}]   ;;  %s2331_s6 = inlined_call_operand.vmem [shape: f32[8,128], index: 6, kind: output, shape index: {}]  }
   0x1   :  { %12 = vsyncpa [#allocation5], 0  ;;  %s1987_s21 = smov [#allocation4]  }
   0x2   :  { %s32_s22 = sshll.u32 %s1987_s21, 4  ;;  %s33_s22 = int_to_ptr.vmem [resolvable:$true] %s32_s22 }
   0x3   :  { %s1931_s23 = scalar_lea.vmem %s33_s22, 14336  ;;  %p1936_p1 = scmp.lt.s32.totalorder %s33_s22, %s33_s22 }
   0x4   :  { %p1932_p0 = scmp.ne.s32.totalorder %s33_s22, %s1931_s23  ;;  %p1937_p2 = scmp.lt.s32.totalorder %s1931_s23, %s1931_s23 }
   0x6   :  { %p1938_p3 = por %p1937_p2, %p1936_p1 }
   0x8   :  { %p1939_p4 = pnand %p1938_p3, %p1932_p0 }
   0xa   :  { %1942 = shalt.err (!%p1939_p4)
}
   0xb   :  { %s1988_s24 = smov 896   ;;  %s1989_s25 = smov 56  }
   0xc   :  { %38 = dma.hbm_to_vmem [thread:$0]  %s2327_s2, 14336, %s33_s22, [#allocation5], %s1988_s24, %s1988_s24, %s1989_s25  }
   0xd   :  { %s1990_s28 = smov [#allocation2]  }
   0xe   :  { %s20_s29 = sshll.u32 %s1990_s28, 4  ;;  %s21_s29 = int_to_ptr.vmem [resolvable:$true] %s20_s29 }
   0xf   :  { %s1951_s30 = scalar_lea.vmem %s21_s29, 16384  ;;  %p1956_p6 = scmp.lt.s32.totalorder %s21_s29, %s21_s29 }
  0x10   :  { %p1952_p5 = scmp.ne.s32.totalorder %s21_s29, %s1951_s30  ;;  %p1957_p7 = scmp.lt.s32.totalorder %s1951_s30, %s1951_s30 }
  0x12   :  { %p1958_p8 = por %p1957_p7, %p1956_p6 }
  0x14   :  { %p1959_p9 = pnand %p1958_p8, %p1952_p5 }
  0x16   :  { %1962 = shalt.err (!%p1959_p9)
}
  0x17   :  { %s1991_s7 = smov 128   ;;  %s1992_s8 = smov 8  }
  0x18   :  { %26 = dma.hbm_to_vmem [thread:$0]  %s2326_s1, 16384, %s21_s29, [#allocation3], %s1991_s7, %s1991_s7, %s1992_s8  }
  0x19   :  { %s1993_s11 = smov [#allocation6]  }
  0x1a   :  { %s46_s12 = sshll.u32 %s1993_s11, 4  ;;  %s47_s12 = int_to_ptr.vmem [resolvable:$true] %s46_s12 }
  0x1b   :  { %s1971_s2 = scalar_lea.vmem %s47_s12, 6144  ;;  %p1976_p11 = scmp.lt.s32.totalorder %s47_s12, %s47_s12 }
  0x1c   :  { %p1972_p10 = scmp.ne.s32.totalorder %s47_s12, %s1971_s2  ;;  %p1977_p12 = scmp.lt.s32.totalorder %s1971_s2, %s1971_s2 }
  0x1e   :  { %p1978_p13 = por %p1977_p12, %p1976_p11 }
  0x20   :  { %p1979_p0 = pnand %p1978_p13, %p1972_p10 }
  0x22   :  { %1982 = shalt.err (!%p1979_p0)
}
  0x23   :  { %52 = dma.hbm_to_vmem [thread:$0]  %s2329_s4, 6144, %s47_s12, [#allocation5], %s1991_s7, %s1991_s7, %s1992_s8  }
  0x24   :  { %1983 = dma.done.wait [#allocation3], 16384  }
  0x25   :  { %1984 = vsyncadd [#allocation3], 4294950912 }
  0x26   :  { %1985 = dma.done.wait [#allocation5], 20480  }
  0x27   :  { %1986 = vsyncadd [#allocation5], 4294946816  ;;  %v1994_v0 = vmov 3   ;;  %v1995_v1 = vmov 1   ;;  %v2054_v2 = vld [vmem:[%s2325_s0] sm:$0xff]  ;;  %v244_v3 = vld [vmem:[#allocation2 + $0xf8] sm:$0xff] }
  0x28   :  { %1902 = vset.pattern.permute.xlu1 %v1994_v0  ;;  %1900 = vset.pattern.permute.xlu0 %v1995_v1  ;;  %v228_v4 = vld [vmem:[#allocation2 + $0x78] sm:$0xff]  ;;  %v243_v6 = vld [vmem:[#allocation2 + $0xf0] sm:$0xff]  ;;  %v1996_v11 = vmov 2   ;;  %v1997_v12 = vmov 0   ;;  %v242_v13 = vld [vmem:[#allocation2 + $0xe8] sm:$0xff]  ;;  %v1998_v38 = vmov 4  }
  0x29   :  { %124 = vperm.xlu1 %1902, %v2054_v2   ;;  %88 = vperm.xlu0 %1900, %v2054_v2   ;;  %v276_v5 = vld [vmem:[#allocation2 + $0x1f8] sm:$0xff]  ;;  %v275_v8 = vld [vmem:[#allocation2 + $0x1f0] sm:$0xff]  ;;  %v274_v14 = vld [vmem:[#allocation2 + $0x1e8] sm:$0xff]  ;;  %v1999_v45 = vmov 5   ;;  %v2000_v52 = vmov 6   ;;  %v2001_v59 = vmov 7  }
  0x2a   :  { %1502 = vmatprep.subr.mxu0 %v244_v3  ;;  %1543 = vmatprep.subr.mxu1 %v276_v5  ;;  %v260_v7 = vld [vmem:[#allocation2 + $0x178] sm:$0xff]  ;;  %v227_v9 = vld [vmem:[#allocation2 + $0x70] sm:$0xff]  ;;  %v226_v15 = vld [vmem:[#allocation2 + $0x68] sm:$0xff] }
  0x2b   :  { %1503 = vmatpush3.msra.mxu0 %v228_v4  ;;  %1544 = vmatpush3.msra.mxu1 %v260_v7  ;;  %v259_v10 = vld [vmem:[#allocation2 + $0x170] sm:$0xff]  ;;  %v258_v16 = vld [vmem:[#allocation2 + $0x168] sm:$0xff]  ;;  %v241_v18 = vld [vmem:[#allocation2 + $0xe0] sm:$0xff] }
  0x2c   :  { %1504 = vmatprep.subr.mxu0 %v243_v6  ;;  %1545 = vmatprep.subr.mxu1 %v275_v8  ;;  %v2065_v17 = vld [vmem:[%s2325_s0 + $0x8] sm:$0xff]  ;;  %v225_v19 = vld [vmem:[#allocation2 + $0x60] sm:$0xff]  ;;  %v240_v21 = vld [vmem:[#allocation2 + $0xd8] sm:$0xff] }
  0x2d   :  { %1903 = vset.pattern.permute.xlu1 %v1996_v11  ;;  %1901 = vset.pattern.permute.xlu0 %v1997_v12  ;;  %v273_v20 = vld [vmem:[#allocation2 + $0x1e0] sm:$0xff]  ;;  %v224_v23 = vld [vmem:[#allocation2 + $0x58] sm:$0xff]  ;;  %v239_v25 = vld [vmem:[#allocation2 + $0xd0] sm:$0xff] }
  0x2e   :  { %106 = vperm.xlu1 %1903, %v2054_v2   ;;  %70 = vperm.xlu0 %1901, %v2054_v2   ;;  %v257_v22 = vld [vmem:[#allocation2 + $0x160] sm:$0xff]  ;;  %v272_v24 = vld [vmem:[#allocation2 + $0x1d8] sm:$0xff]  ;;  %v223_v27 = vld [vmem:[#allocation2 + $0x50] sm:$0xff] }
  0x2f   :  { %1505 = vmatpush3.msra.mxu0 %v227_v9  ;;  %1546 = vmatpush3.msra.mxu1 %v259_v10  ;;  %v256_v26 = vld [vmem:[#allocation2 + $0x158] sm:$0xff]  ;;  %v271_v28 = vld [vmem:[#allocation2 + $0x1d0] sm:$0xff]  ;;  %v238_v29 = vld [vmem:[#allocation2 + $0xc8] sm:$0xff] }
  0x30   :  { %1506 = vmatprep.subr.mxu0 %v242_v13  ;;  %1547 = vmatprep.subr.mxu1 %v274_v14  ;;  %v2077_v30 = vld [vmem:[%s2325_s0 + $0x10] sm:$0xff]  ;;  %v222_v32 = vld [vmem:[#allocation2 + $0x48] sm:$0xff]  ;;  %v237_v34 = vld [vmem:[#allocation2 + $0xc0] sm:$0xff] }
  0x31   :  { %1507 = vmatpush3.msra.mxu0 %v226_v15  ;;  %1548 = vmatpush3.msra.mxu1 %v258_v16  ;;  %v255_v31 = vld [vmem:[#allocation2 + $0x150] sm:$0xff]  ;;  %v270_v33 = vld [vmem:[#allocation2 + $0x1c8] sm:$0xff]  ;;  %v221_v36 = vld [vmem:[#allocation2 + $0x40] sm:$0xff] }
  0x32   :  { %1904 = vset.pattern.permute.xlu1 %v1995_v1  ;;  %73 = vperm.xlu0 %1901, %v2065_v17   ;;  %v254_v35 = vld [vmem:[#allocation2 + $0x148] sm:$0xff]  ;;  %v269_v37 = vld [vmem:[#allocation2 + $0x1c0] sm:$0xff]  ;;  %v236_v39 = vld [vmem:[#allocation2 + $0xb8] sm:$0xff] }
  0x33   :  { %91 = vperm.xlu1 %1904, %v2065_v17   ;;  %1508 = vmatprep.subr.mxu0 %v241_v18  ;;  %v253_v40 = vld [vmem:[#allocation2 + $0x140] sm:$0xff]  ;;  %v220_v41 = vld [vmem:[#allocation2 + $0x38] sm:$0xff]  ;;  %v235_v43 = vld [vmem:[#allocation2 + $0xb0] sm:$0xff] }
  0x34   :  { %1509 = vmatpush3.msra.mxu0 %v225_v19  ;;  %1549 = vmatprep.subr.mxu1 %v273_v20  ;;  %v268_v42 = vld [vmem:[#allocation2 + $0x1b8] sm:$0xff]  ;;  %v219_v46 = vld [vmem:[#allocation2 + $0x30] sm:$0xff]  ;;  %v234_v48 = vld [vmem:[#allocation2 + $0xa8] sm:$0xff] }
  0x35   :  { %1510 = vmatprep.subr.mxu0 %v240_v21  ;;  %1550 = vmatpush3.msra.mxu1 %v257_v22  ;;  %v252_v44 = vld [vmem:[#allocation2 + $0x138] sm:$0xff]  ;;  %v267_v47 = vld [vmem:[#allocation2 + $0x1b0] sm:$0xff]  ;;  %v218_v50 = vld [vmem:[#allocation2 + $0x28] sm:$0xff] }
  0x36   :  { %1906 = vset.pattern.permute.xlu0 %v1996_v11  ;;  %1511 = vmatpush3.msra.mxu0 %v224_v23  ;;  %v251_v49 = vld [vmem:[#allocation2 + $0x130] sm:$0xff]  ;;  %v266_v51 = vld [vmem:[#allocation2 + $0x1a8] sm:$0xff]  ;;  %v233_v53 = vld [vmem:[#allocation2 + $0xa0] sm:$0xff] }
  0x37   :  { %1905 = vset.pattern.permute.xlu1 %v1994_v0  ;;  %109 = vperm.xlu0 %1906, %v2065_v17   ;;  %v250_v54 = vld [vmem:[#allocation2 + $0x128] sm:$0xff]  ;;  %v217_v55 = vld [vmem:[#allocation2 + $0x20] sm:$0xff]  ;;  %v232_v57 = vld [vmem:[#allocation2 + $0x98] sm:$0xff] }
  0x38   :  { %127 = vperm.xlu1 %1905, %v2065_v17   ;;  %1551 = vmatprep.subr.mxu1 %v272_v24  ;;  %v265_v56 = vld [vmem:[#allocation2 + $0x1a0] sm:$0xff]  ;;  %v216_v60 = vld [vmem:[#allocation2 + $0x18] sm:$0xff]  ;;  %v231_v62 = vld [vmem:[#allocation2 + $0x90] sm:$0xff] }
  0x39   :  { %1512 = vmatprep.subr.mxu0 %v239_v25  ;;  %1552 = vmatpush3.msra.mxu1 %v256_v26  ;;  %v249_v58 = vld [vmem:[#allocation2 + $0x120] sm:$0xff]  ;;  %v264_v61 = vld [vmem:[#allocation2 + $0x198] sm:$0xff]  ;;  %v230_v3 = vld [vmem:[#allocation2 + $0x88] sm:$0xff] }
  0x3a   :  { %1513 = vmatpush3.msra.mxu0 %v223_v27  ;;  %1553 = vmatprep.subr.mxu1 %v271_v28  ;;  %v248_v63 = vld [vmem:[#allocation2 + $0x118] sm:$0xff]  ;;  %v247_v4 = vld [vmem:[#allocation2 + $0x110] sm:$0xff]  ;;  %v214_v5 = vld [vmem:[#allocation2 + $0x8] sm:$0xff] }
  0x3b   :  { %1909 = vset.pattern.permute.xlu0 %v1994_v0  ;;  %1514 = vmatprep.subr.mxu0 %v238_v29  ;;  %v215_v0 = vld [vmem:[#allocation2 + $0x10] sm:$0xff]  ;;  %v262_v6 = vld [vmem:[#allocation2 + $0x188] sm:$0xff]  ;;  %v229_v7 = vld [vmem:[#allocation2 + $0x80] sm:$0xff] }
  0x3c   :  { %1907 = vset.pattern.permute.xlu1 %v1995_v1  ;;  %130 = vperm.xlu0 %1909, %v2077_v30   ;;  %v263_v1 = vld [vmem:[#allocation2 + $0x190] sm:$0xff]  ;;  %v246_v8 = vld [vmem:[#allocation2 + $0x108] sm:$0xff]  ;;  %v213_v9 = vld [vmem:[#allocation2] sm:$0xff] }
  0x3d   :  { %94 = vperm.xlu1 %1907, %v2077_v30   ;;  %1554 = vmatpush3.msra.mxu1 %v255_v31  ;;  %v261_v10 = vld [vmem:[#allocation2 + $0x180] sm:$0xff]  ;;  %v340_v13 = vld [vmem:[#allocation2 + $0x3f8] sm:$0xff]  ;;  %v307_v22 = vld [vmem:[#allocation2 + $0x2f0] sm:$0xff] }
  0x3e   :  { %1515 = vmatpush3.msra.mxu0 %v222_v32  ;;  %1555 = vmatprep.subr.mxu1 %v270_v33  ;;  %v292_v20 = vld [vmem:[#allocation2 + $0x278] sm:$0xff]  ;;  %v339_v23 = vld [vmem:[#allocation2 + $0x3f0] sm:$0xff]  ;;  %v306_v26 = vld [vmem:[#allocation2 + $0x2e8] sm:$0xff] }
  0x3f   :  { %1516 = vmatprep.subr.mxu0 %v237_v34  ;;  %1556 = vmatpush3.msra.mxu1 %v254_v35  ;;  %v324_v21 = vld [vmem:[#allocation2 + $0x378] sm:$0xff]  ;;  %v291_v24 = vld [vmem:[#allocation2 + $0x270] sm:$0xff]  ;;  %v338_v27 = vld [vmem:[#allocation2 + $0x3e8] sm:$0xff] }
  0x40   :  { %1912 = vset.pattern.permute.xlu0 %v1998_v38  ;;  %1517 = vmatpush3.msra.mxu0 %v221_v36  ;;  %v323_v25 = vld [vmem:[#allocation2 + $0x370] sm:$0xff]  ;;  %v290_v28 = vld [vmem:[#allocation2 + $0x268] sm:$0xff]  ;;  %v305_v31 = vld [vmem:[#allocation2 + $0x2e0] sm:$0xff] }
  0x41   :  { %1908 = vset.pattern.permute.xlu1 %v1997_v12  ;;  %142 = vperm.xlu0 %1912, %v2054_v2   ;;  %v308_v12 = vld [vmem:[#allocation2 + $0x2f8] sm:$0xff]  ;;  %v289_v32 = vld [vmem:[#allocation2 + $0x260] sm:$0xff]  ;;  %v322_v33 = vld [vmem:[#allocation2 + $0x368] sm:$0xff] }
  0x42   :  { %76 = vperm.xlu1 %1908, %v2077_v30   ;;  %1557 = vmatprep.subr.mxu1 %v269_v37  ;;  %v304_v34 = vld [vmem:[#allocation2 + $0x2d8] sm:$0xff]  ;;  %v337_v35 = vld [vmem:[#allocation2 + $0x3e0] sm:$0xff] }
  0x43   :  { %1518 = vmatprep.subr.mxu0 %v236_v39  ;;  %1558 = vmatpush3.msra.mxu1 %v253_v40  ;;  %v288_v36 = vld [vmem:[#allocation2 + $0x258] sm:$0xff]  ;;  %v321_v37 = vld [vmem:[#allocation2 + $0x360] sm:$0xff] }
  0x44   :  { %1519 = vmatpush3.msra.mxu0 %v220_v41  ;;  %1559 = vmatprep.subr.mxu1 %v268_v42  ;;  %v287_v41 = vld [vmem:[#allocation2 + $0x250] sm:$0xff]  ;;  %v302_v42 = vld [vmem:[#allocation2 + $0x2c8] sm:$0xff] }
  0x45   :  { %1915 = vset.pattern.permute.xlu0 %v1999_v45  ;;  %1520 = vmatprep.subr.mxu0 %v235_v43  ;;  %v336_v43 = vld [vmem:[#allocation2 + $0x3d8] sm:$0xff] }
  0x46   :  { %1910 = vset.pattern.permute.xlu1 %v1996_v11  ;;  %163 = vperm.xlu0 %1915, %v2065_v17   ;;  %v245_v11 = vld [vmem:[#allocation2 + $0x100] sm:$0xff] }
  0x47   :  { %112 = vperm.xlu1 %1910, %v2077_v30   ;;  %1560 = vmatpush3.msra.mxu1 %v252_v44  ;;  %v286_v44 = vld [vmem:[#allocation2 + $0x248] sm:$0xff] }
  0x48   :  { %1521 = vmatpush3.msra.mxu0 %v219_v46  ;;  %1561 = vmatprep.subr.mxu1 %v267_v47  ;;  %v301_v46 = vld [vmem:[#allocation2 + $0x2c0] sm:$0xff]  ;;  %v335_v47 = vld [vmem:[#allocation2 + $0x3d0] sm:$0xff] }
  0x49   :  { %1522 = vmatprep.subr.mxu0 %v234_v48  ;;  %1562 = vmatpush3.msra.mxu1 %v251_v49  ;;  %v285_v48 = vld [vmem:[#allocation2 + $0x240] sm:$0xff] }
  0x4a   :  { %1918 = vset.pattern.permute.xlu0 %v2000_v52  ;;  %1523 = vmatpush3.msra.mxu0 %v218_v50  ;;  %v300_v50 = vld [vmem:[#allocation2 + $0x2b8] sm:$0xff] }
  0x4b   :  { %1911 = vset.pattern.permute.xlu1 %v1999_v45  ;;  %181 = vperm.xlu0 %1918, %v2065_v17  }
  0x4c   :  { %160 = vperm.xlu1 %1911, %v2054_v2   ;;  %1563 = vmatprep.subr.mxu1 %v266_v51  ;;  %v319_v51 = vld [vmem:[#allocation2 + $0x350] sm:$0xff] }
  0x4d   :  { %1524 = vmatprep.subr.mxu0 %v233_v53  ;;  %1564 = vmatpush3.msra.mxu1 %v250_v54  ;;  %v334_v53 = vld [vmem:[#allocation2 + $0x3c8] sm:$0xff]  ;;  %v299_v54 = vld [vmem:[#allocation2 + $0x2b0] sm:$0xff] }
  0x4e   :  { %1525 = vmatpush3.msra.mxu0 %v217_v55  ;;  %1565 = vmatprep.subr.mxu1 %v265_v56  ;;  %v318_v55 = vld [vmem:[#allocation2 + $0x348] sm:$0xff]  ;;  %v283_v56 = vld [vmem:[#allocation2 + $0x230] sm:$0xff] }
  0x4f   :  { %1921 = vset.pattern.permute.xlu0 %v2001_v59  ;;  %1526 = vmatprep.subr.mxu0 %v232_v57  ;;  %v333_v57 = vld [vmem:[#allocation2 + $0x3c0] sm:$0xff] }
  0x50   :  { %1913 = vset.pattern.permute.xlu1 %v2001_v59  ;;  %202 = vperm.xlu0 %1921, %v2077_v30  }
  0x51   :  { %196 = vperm.xlu1 %1913, %v2054_v2   ;;  %1566 = vmatpush3.msra.mxu1 %v249_v58 }
  0x52   :  { %1527 = vmatpush3.msra.mxu0 %v216_v60  ;;  %1567 = vmatprep.subr.mxu1 %v264_v61  ;;  %v282_v61 = vld [vmem:[#allocation2 + $0x228] sm:$0xff] }
  0x53   :  { %1528 = vmatprep.subr.mxu0 %v231_v62  ;;  %1568 = vmatpush3.msra.mxu1 %v248_v63  ;;  %v317_v62 = vld [vmem:[#allocation2 + $0x340] sm:$0xff] }
  0x54   :  { %1529 = vmatpush3.msra.mxu0 %v215_v0  ;;  %1569 = vmatprep.subr.mxu1 %v263_v1  ;;  %v297_v63 = vld [vmem:[#allocation2 + $0x2a0] sm:$0xff]  ;;  %v332_v1 = vld [vmem:[#allocation2 + $0x3b8] sm:$0xff] }
  0x55   :  { %1914 = vset.pattern.permute.xlu1 %v2000_v52  ;;  %1530 = vmatprep.subr.mxu0 %v230_v3  ;;  %v281_v0 = vld [vmem:[#allocation2 + $0x220] sm:$0xff]  ;;  %v296_v3 = vld [vmem:[#allocation2 + $0x298] sm:$0xff] }
  0x56   :  { %178 = vperm.xlu1 %1914, %v2054_v2   ;;  %1570 = vmatpush3.msra.mxu1 %v247_v4  ;;  %v64_v2 = vlaneseq  ;;  %v316_v4 = vld [vmem:[#allocation2 + $0x338] sm:$0xff] }
  0x57   :  { %1531 = vmatpush3.msra.mxu0 %v214_v5  ;;  %1571 = vmatprep.subr.mxu1 %v262_v6  ;;  %v280_v5 = vld [vmem:[#allocation2 + $0x218] sm:$0xff] }
  0x58   :  { %1532 = vmatprep.subr.mxu0 %v229_v7  ;;  %1572 = vmatpush3.msra.mxu1 %v246_v8  ;;  %v2109_v14 = vand.u32 127, %v64_v2  ;;  %v295_v7 = vld [vmem:[#allocation2 + $0x290] sm:$0xff] }
  0x59   :  { %1533 = vmatpush3.msra.mxu0 %v213_v9  ;;  %1573 = vmatprep.subr.mxu1 %v261_v10  ;;  %v331_v8 = vld [vmem:[#allocation2 + $0x3b0] sm:$0xff] }
  0x5a   :  { %1916 = vset.pattern.permute.xlu1 %v1998_v38  ;;  %1574 = vmatpush3.msra.mxu1 %v245_v11  ;;  %v279_v10 = vld [vmem:[#allocation2 + $0x210] sm:$0xff] }
  0x5b   :  { %145 = vperm.xlu1 %1916, %v2065_v17   ;;  %1584 = vmatprep.subr.mxu0 %v308_v12  ;;  %v315_v11 = vld [vmem:[#allocation2 + $0x330] sm:$0xff]  ;;  %v294_v12 = vld [vmem:[#allocation2 + $0x288] sm:$0xff] }
  0x5c   :  { %1625 = vmatprep.subr.mxu1 %v340_v13  ;;  %v330_v13 = vld [vmem:[#allocation2 + $0x3a8] sm:$0xff] }
  0x5f   :  { %1917 = vset.pattern.permute.xlu1 %v2001_v59  ;;  %v298_v59 = vld [vmem:[#allocation2 + $0x2a8] sm:$0xff] }
  0x60   :  { %199 = vperm.xlu1 %1917, %v2065_v17   ;;  %v2002_v17 = vmov 1.0  }
  0x64   :  { %1919 = vset.pattern.permute.xlu1 %v1999_v45  ;;  %v320_v45 = vld [vmem:[#allocation2 + $0x358] sm:$0xff] }
  0x65   :  { %166 = vperm.xlu1 %1919, %v2077_v30  }
  0x69   :  { %1920 = vset.pattern.permute.xlu1 %v1998_v38  ;;  %v303_v38 = vld [vmem:[#allocation2 + $0x2d0] sm:$0xff] }
  0x6a   :  { %148 = vperm.xlu1 %1920, %v2077_v30  }
  0x6e   :  { %1922 = vset.pattern.permute.xlu1 %v2000_v52  ;;  %v284_v52 = vld [vmem:[#allocation2 + $0x238] sm:$0xff] }
  0x6f   :  { %184 = vperm.xlu1 %1922, %v2077_v30  }
  0xa4   :  { %v125_v15 = vpop.permute.xlu1 %124  ;;  %v89_v16 = vpop.permute.xlu0 %88 }
  0xa5   :  { %vm132_vm0 = vcmp.eq.s32.totalorder %v125_v15, %v2109_v14  ;;  %vm96_vm1 = vcmp.eq.s32.totalorder %v89_v16, %v2109_v14  ;;  %v278_v15 = vld [vmem:[#allocation2 + $0x208] sm:$0xff] }
  0xa6   :  { %1483 = vmatprep.mubr.msk.f32.mxu1 %vm132_vm0, %v2002_v17  ;;  %1477 = vmatprep.mubr.msk.f32.mxu0 %vm96_vm1, %v2002_v17  ;;  %v314_v16 = vld [vmem:[#allocation2 + $0x328] sm:$0xff] }
  0xa9   :  { %v107_v18 = vpop.permute.xlu1 %106  ;;  %v71_v19 = vpop.permute.xlu0 %70 }
  0xaa   :  { %vm114_vm2 = vcmp.eq.s32.totalorder %v107_v18, %v2109_v14  ;;  %vm78_vm3 = vcmp.eq.s32.totalorder %v71_v19, %v2109_v14  ;;  %v293_v18 = vld [vmem:[#allocation2 + $0x280] sm:$0xff] }
  0xab   :  { %1478 = vmatmul.mubr.msk.f32.vlgmr.msra.gmra.mxu0 %vm78_vm3, %v2002_v17  ;;  %1484 = vmatmul.mubr.msk.f32.vlgmr.msra.gmra.mxu1 %vm114_vm2, %v2002_v17 }
  0xac   :  { %1585 = vmatpush3.msra.mxu0 %v292_v20  ;;  %1626 = vmatpush3.msra.mxu1 %v324_v21  ;;  %v277_v21 = vld [vmem:[#allocation2 + $0x200] sm:$0xff] }
  0xad   :  { %1586 = vmatprep.subr.mxu0 %v307_v22  ;;  %v74_v29 = vpop.permute.xlu0 %73  ;;  %1627 = vmatprep.subr.mxu1 %v339_v23  ;;  %v329_v22 = vld [vmem:[#allocation2 + $0x3a0] sm:$0xff] }
  0xae   :  { %1587 = vmatpush3.msra.mxu0 %v291_v24  ;;  %v92_v30 = vpop.permute.xlu1 %91  ;;  %vm79_vm4 = vcmp.eq.s32.totalorder %v74_v29, %v2109_v14  ;;  %1628 = vmatpush3.msra.mxu1 %v323_v25  ;;  %v313_v23 = vld [vmem:[#allocation2 + $0x320] sm:$0xff]  ;;  %v328_v24 = vld [vmem:[#allocation2 + $0x398] sm:$0xff]  ;;  %v326_v29 = vld [vmem:[#allocation2 + $0x388] sm:$0xff] }
  0xaf   :  { %vm97_vm5 = vcmp.eq.s32.totalorder %v92_v30, %v2109_v14  ;;  %1588 = vmatprep.subr.mxu0 %v306_v26  ;;  %1629 = vmatprep.subr.mxu1 %v338_v27  ;;  %v312_v25 = vld [vmem:[#allocation2 + $0x318] sm:$0xff]  ;;  %v327_v26 = vld [vmem:[#allocation2 + $0x390] sm:$0xff]  ;;  %v310_v30 = vld [vmem:[#allocation2 + $0x308] sm:$0xff] }
  0xb0   :  { %1589 = vmatpush3.msra.mxu0 %v290_v28  ;;  %1479 = vmatprep.mubr.msk.f32.mxu0 %vm97_vm5, %v2002_v17  ;;  %v311_v28 = vld [vmem:[#allocation2 + $0x310] sm:$0xff] }
  0xb1   :  { %1590 = vmatprep.subr.mxu0 %v305_v31  ;;  %1480 = vmatmul.mubr.msk.f32.gmra.mxu0 %vm79_vm4, %v2002_v17  ;;  %v325_v31 = vld [vmem:[#allocation2 + $0x380] sm:$0xff] }
  0xb2   :  { %1591 = vmatpush3.msra.mxu0 %v289_v32  ;;  %v110_v39 = vpop.permute.xlu0 %109  ;;  %1630 = vmatpush3.msra.mxu1 %v322_v33  ;;  %v309_v32 = vld [vmem:[#allocation2 + $0x300] sm:$0xff] }
  0xb3   :  { %1592 = vmatprep.subr.mxu0 %v304_v34  ;;  %v128_v40 = vpop.permute.xlu1 %127  ;;  %vm115_vm6 = vcmp.eq.s32.totalorder %v110_v39, %v2109_v14  ;;  %1631 = vmatprep.subr.mxu1 %v337_v35 }
  0xb4   :  { %vm133_vm7 = vcmp.eq.s32.totalorder %v128_v40, %v2109_v14  ;;  %1593 = vmatpush3.msra.mxu0 %v288_v36  ;;  %1632 = vmatpush3.msra.mxu1 %v321_v37 }
  0xb5   :  { %1594 = vmatprep.subr.mxu0 %v303_v38  ;;  %1485 = vmatprep.mubr.msk.f32.mxu1 %vm133_vm7, %v2002_v17 }
  0xb6   :  { %1595 = vmatpush3.msra.mxu0 %v287_v41  ;;  %1486 = vmatmul.mubr.msk.f32.gmra.mxu1 %vm115_vm6, %v2002_v17  ;;  %v767_v41 = vld [vmem:[#allocation4 + $0x350] sm:$0xff] }
  0xb7   :  { %1596 = vmatprep.subr.mxu0 %v302_v42  ;;  %1633 = vmatprep.subr.mxu1 %v336_v43  ;;  %v131_v58 = vpop.permute.xlu0 %130  ;;  %v769_v42 = vld [vmem:[#allocation4 + $0x360] sm:$0xff]  ;;  %v766_v43 = vld [vmem:[#allocation4 + $0x348] sm:$0xff] }
  0xb8   :  { %1597 = vmatpush3.msra.mxu0 %v286_v44  ;;  %v95_v49 = vpop.permute.xlu1 %94  ;;  %1634 = vmatpush3.msra.mxu1 %v320_v45  ;;  %vm134_vm10 = vcmp.eq.s32.totalorder %v131_v58, %v2109_v14  ;;  %v768_v44 = vld [vmem:[#allocation4 + $0x358] sm:$0xff] }
  0xb9   :  { %vm98_vm8 = vcmp.eq.s32.totalorder %v95_v49, %v2109_v14  ;;  %1598 = vmatprep.subr.mxu0 %v301_v46  ;;  %1635 = vmatprep.subr.mxu1 %v335_v47  ;;  %v760_v45 = vld [vmem:[#allocation4 + $0x318] sm:$0xff]  ;;  %v762_v46 = vld [vmem:[#allocation4 + $0x328] sm:$0xff]  ;;  %v759_v47 = vld [vmem:[#allocation4 + $0x310] sm:$0xff] }
  0xba   :  { %1599 = vmatpush3.msra.mxu0 %v285_v48  ;;  %1481 = vmatprep.mubr.msk.f32.mxu0 %vm98_vm8, %v2002_v17  ;;  %v761_v48 = vld [vmem:[#allocation4 + $0x320] sm:$0xff]  ;;  %v740_v58 = vld [vmem:[#allocation4 + $0x278] sm:$0xff]  ;;  %vm2004_vm8 = vmmov 0  }
  0xbb   :  { %1600 = vmatprep.subr.mxu0 %v300_v50  ;;  %1636 = vmatpush3.msra.mxu1 %v319_v51  ;;  %v753_v49 = vld [vmem:[#allocation4 + $0x2e0] sm:$0xff]  ;;  %v755_v50 = vld [vmem:[#allocation4 + $0x2f0] sm:$0xff]  ;;  %v746_v51 = vld [vmem:[#allocation4 + $0x2a8] sm:$0xff] }
  0xbc   :  { %1601 = vmatpush3.msra.mxu0 %v284_v52  ;;  %1637 = vmatprep.subr.mxu1 %v334_v53  ;;  %v143_v9 = vpop.permute.xlu0 %142  ;;  %v748_v52 = vld [vmem:[#allocation4 + $0x2b8] sm:$0xff]  ;;  %v745_v53 = vld [vmem:[#allocation4 + $0x2a0] sm:$0xff] }
  0xbd   :  { %1602 = vmatprep.subr.mxu0 %v299_v54  ;;  %v77_v60 = vpop.permute.xlu1 %76  ;;  %1638 = vmatpush3.msra.mxu1 %v318_v55  ;;  %vm150_vm13 = vcmp.eq.s32.totalorder %v143_v9, %v2109_v14  ;;  %v747_v54 = vld [vmem:[#allocation4 + $0x2b0] sm:$0xff]  ;;  %v713_v9 = vld [vmem:[#allocation4 + $0x1a0] sm:$0xff] }
  0xbe   :  { %vm80_vm9 = vcmp.eq.s32.totalorder %v77_v60, %v2109_v14  ;;  %1603 = vmatpush3.msra.mxu0 %v283_v56  ;;  %1639 = vmatprep.subr.mxu1 %v333_v57  ;;  %v739_v55 = vld [vmem:[#allocation4 + $0x270] sm:$0xff]  ;;  %v741_v56 = vld [vmem:[#allocation4 + $0x280] sm:$0xff]  ;;  %v738_v57 = vld [vmem:[#allocation4 + $0x268] sm:$0xff] }
  0xbf   :  { %1604 = vmatprep.subr.mxu0 %v298_v59  ;;  %1482 = vmatmul.mubr.msk.f32.gmra.mxu0 %vm80_vm9, %v2002_v17  ;;  %v732_v59 = vld [vmem:[#allocation4 + $0x238] sm:$0xff]  ;;  %v734_v60 = vld [vmem:[#allocation4 + $0x248] sm:$0xff] }
  0xc0   :  { %1605 = vmatpush3.msra.mxu0 %v282_v61  ;;  %1640 = vmatpush3.msra.mxu1 %v317_v62  ;;  %v731_v61 = vld [vmem:[#allocation4 + $0x230] sm:$0xff]  ;;  %v733_v62 = vld [vmem:[#allocation4 + $0x240] sm:$0xff] }
  0xc1   :  { %1606 = vmatprep.subr.mxu0 %v297_v63  ;;  %1487 = vmatprep.mubr.msk.f32.mxu1 %vm134_vm10, %v2002_v17  ;;  %v164_v19 = vpop.permute.xlu0 %163  ;;  %v725_v63 = vld [vmem:[#allocation4 + $0x200] sm:$0xff] }
  0xc2   :  { %1607 = vmatpush3.msra.mxu0 %v281_v0  ;;  %v113_v6 = vpop.permute.xlu1 %112  ;;  %1641 = vmatprep.subr.mxu1 %v332_v1  ;;  %vm169_vm14 = vcmp.eq.s32.totalorder %v164_v19, %v2109_v14  ;;  %v727_v0 = vld [vmem:[#allocation4 + $0x210] sm:$0xff]  ;;  %v724_v1 = vld [vmem:[#allocation4 + $0x1f8] sm:$0xff] }
  0xc3   :  { %vm116_vm11 = vcmp.eq.s32.totalorder %v113_v6, %v2109_v14  ;;  %1608 = vmatprep.subr.mxu0 %v296_v3  ;;  %1642 = vmatpush3.msra.mxu1 %v316_v4  ;;  %v726_v3 = vld [vmem:[#allocation4 + $0x208] sm:$0xff]  ;;  %v717_v6 = vld [vmem:[#allocation4 + $0x1c0] sm:$0xff]  ;;  %v699_v19 = vld [vmem:[#allocation4 + $0x130] sm:$0xff] }
  0xc4   :  { %1609 = vmatpush3.msra.mxu0 %v280_v5  ;;  %1488 = vmatmul.mubr.msk.f32.gmra.mxu1 %vm116_vm11, %v2002_v17  ;;  %v718_v4 = vld [vmem:[#allocation4 + $0x1c8] sm:$0xff]  ;;  %v720_v5 = vld [vmem:[#allocation4 + $0x1d8] sm:$0xff] }
  0xc5   :  { %1610 = vmatprep.subr.mxu0 %v295_v7  ;;  %1643 = vmatprep.subr.mxu1 %v331_v8  ;;  %v719_v7 = vld [vmem:[#allocation4 + $0x1d0] sm:$0xff] }
  0xc6   :  { %1611 = vmatpush3.msra.mxu0 %v279_v10  ;;  %1644 = vmatpush3.msra.mxu1 %v315_v11  ;;  %v182_v34 = vpop.permute.xlu0 %181  ;;  %v711_v8 = vld [vmem:[#allocation4 + $0x190] sm:$0xff]  ;;  %v710_v10 = vld [vmem:[#allocation4 + $0x188] sm:$0xff]  ;;  %v712_v11 = vld [vmem:[#allocation4 + $0x198] sm:$0xff] }
  0xc7   :  { %1612 = vmatprep.subr.mxu0 %v294_v12  ;;  %1645 = vmatprep.subr.mxu1 %v330_v13  ;;  %v161_v20 = vpop.permute.xlu1 %160  ;;  %vm187_vm2 = vcmp.eq.s32.totalorder %v182_v34, %v2109_v14  ;;  %v704_v12 = vld [vmem:[#allocation4 + $0x158] sm:$0xff]  ;;  %v706_v13 = vld [vmem:[#allocation4 + $0x168] sm:$0xff]  ;;  %v669_v34 = vld [vmem:[#allocation4 + $0x40] sm:$0xff] }
  0xc8   :  { %vm168_vm12 = vcmp.eq.s32.totalorder %v161_v20, %v2109_v14  ;;  %1613 = vmatpush3.msra.mxu0 %v278_v15  ;;  %1646 = vmatpush3.msra.mxu1 %v314_v16  ;;  %v703_v15 = vld [vmem:[#allocation4 + $0x150] sm:$0xff]  ;;  %v705_v16 = vld [vmem:[#allocation4 + $0x160] sm:$0xff]  ;;  %v696_v20 = vld [vmem:[#allocation4 + $0x118] sm:$0xff] }
  0xc9   :  { %1614 = vmatprep.subr.mxu0 %v293_v18  ;;  %1489 = vmatprep.mubr.msk.f32.mxu0 %vm168_vm12, %v2002_v17  ;;  %v697_v18 = vld [vmem:[#allocation4 + $0x120] sm:$0xff] }
  0xca   :  { %1615 = vmatpush3.msra.mxu0 %v277_v21  ;;  %1647 = vmatprep.subr.mxu1 %v329_v22  ;;  %v698_v21 = vld [vmem:[#allocation4 + $0x128] sm:$0xff] }
  0xcb   :  { %1490 = vmatmul.mubr.msk.f32.vlgmr.msra.gmra.mxu0 %vm150_vm13, %v2002_v17  ;;  %1648 = vmatpush3.msra.mxu1 %v313_v23  ;;  %v203_v36 = vpop.permute.xlu0 %202  ;;  %v690_v22 = vld [vmem:[#allocation4 + $0xe8] sm:$0xff]  ;;  %v692_v23 = vld [vmem:[#allocation4 + $0xf8] sm:$0xff] }
  0xcc   :  { %1649 = vmatprep.subr.mxu1 %v328_v24  ;;  %v197_v27 = vpop.permute.xlu1 %196  ;;  %1491 = vmatprep.mubr.msk.f32.mxu0 %vm169_vm14, %v2002_v17  ;;  %vm206_vm4 = vcmp.eq.s32.totalorder %v203_v36, %v2109_v14  ;;  %v689_v24 = vld [vmem:[#allocation4 + $0xe0] sm:$0xff]  ;;  %v668_v36 = vld [vmem:[#allocation4 + $0x38] sm:$0xff] }
  0xcd   :  { %1650 = vmatpush3.msra.mxu1 %v312_v25  ;;  %vm204_vm15 = vcmp.eq.s32.totalorder %v197_v27, %v2109_v14  ;;  %810 = vmatprep.subr.mxu0 %v767_v41  ;;  %v691_v25 = vld [vmem:[#allocation4 + $0xf0] sm:$0xff]  ;;  %v685_v27 = vld [vmem:[#allocation4 + $0xc0] sm:$0xff] }
  0xce   :  { %1651 = vmatprep.subr.mxu1 %v327_v26  ;;  %1495 = vmatprep.mubr.msk.f32.mxu1 %vm204_vm15, %v2002_v17  ;;  %v683_v26 = vld [vmem:[#allocation4 + $0xb0] sm:$0xff] }
  0xcf   :  { %1652 = vmatpush3.msra.mxu1 %v311_v28  ;;  %811 = vmatpush1.msra.mxu0 %v766_v43  ;;  %v682_v28 = vld [vmem:[#allocation4 + $0xa8] sm:$0xff]  ;;  %v663_v41 = vld [vmem:[#allocation4 + $0x10] sm:$0xff]  ;;  %v2003_v43 = vmov 0.0  }
  0xd0   :  { %1653 = vmatprep.subr.mxu1 %v326_v29  ;;  %812 = vmatprep.subr.mxu0 %v760_v45  ;;  %v684_v29 = vld [vmem:[#allocation4 + $0xb8] sm:$0xff] }
  0xd1   :  { %1654 = vmatpush3.msra.mxu1 %v310_v30  ;;  %v179_v33 = vpop.permute.xlu1 %178  ;;  %813 = vmatpush1.msra.mxu0 %v759_v47  ;;  %v676_v30 = vld [vmem:[#allocation4 + $0x78] sm:$0xff] }
  0xd2   :  { %1655 = vmatprep.subr.mxu1 %v325_v31  ;;  %vm186_vm0 = vcmp.eq.s32.totalorder %v179_v33, %v2109_v14  ;;  %814 = vmatprep.subr.mxu0 %v753_v49  ;;  %v678_v31 = vld [vmem:[#allocation4 + $0x88] sm:$0xff]  ;;  %v677_v33 = vld [vmem:[#allocation4 + $0x80] sm:$0xff] }
  0xd3   :  { %1656 = vmatpush3.msra.mxu1 %v309_v32  ;;  %v675_v32 = vld [vmem:[#allocation4 + $0x70] sm:$0xff] }
  0xd4   :  { %1496 = vmatmul.mubr.msk.f32.vlgmr.msra.gmra.mxu1 %vm186_vm0, %v2002_v17  ;;  %893 = vmatprep.subr.mxu1 %v769_v42  ;;  %v771_v42 = vld [vmem:[#allocation4 + $0x370] sm:$0xff] }
  0xd5   :  { %894 = vmatpush1.msra.mxu1 %v768_v44 }
  0xd6   :  { %v146_v35 = vpop.permute.xlu1 %145  ;;  %895 = vmatprep.subr.mxu1 %v762_v46 }
  0xd7   :  { %vm151_vm1 = vcmp.eq.s32.totalorder %v146_v35, %v2109_v14  ;;  %896 = vmatpush1.msra.mxu1 %v761_v48  ;;  %v671_v35 = vld [vmem:[#allocation4 + $0x50] sm:$0xff] }
  0xd8   :  { %1492 = vmatmul.mubr.msk.f32.gmra.mxu0 %vm151_vm1, %v2002_v17  ;;  %897 = vmatprep.subr.mxu1 %v755_v50 }
  0xdb   :  { %v200_v37 = vpop.permute.xlu1 %199 }
  0xdc   :  { %vm205_vm3 = vcmp.eq.s32.totalorder %v200_v37, %v2109_v14  ;;  %v670_v37 = vld [vmem:[#allocation4 + $0x48] sm:$0xff] }
  0xdd   :  { %1497 = vmatprep.mubr.msk.f32.mxu1 %vm205_vm3, %v2002_v17 }
  0xde   :  { %1498 = vmatmul.mubr.msk.f32.gmra.mxu1 %vm187_vm2, %v2002_v17 }
  0xdf   :  { %1499 = vmatprep.mubr.msk.f32.mxu1 %vm206_vm4, %v2002_v17 }
  0xe0   :  { %v167_v38 = vpop.permute.xlu1 %166 }
  0xe1   :  { %vm170_vm5 = vcmp.eq.s32.totalorder %v167_v38, %v2109_v14  ;;  %v662_v38 = vld [vmem:[#allocation4 + $0x8] sm:$0xff] }
  0xe2   :  { %1493 = vmatprep.mubr.msk.f32.mxu0 %vm170_vm5, %v2002_v17 }
  0xe5   :  { %v149_v39 = vpop.permute.xlu1 %148 }
  0xe6   :  { %vm152_vm6 = vcmp.eq.s32.totalorder %v149_v39, %v2109_v14  ;;  %v664_v39 = vld [vmem:[#allocation4 + $0x18] sm:$0xff] }
  0xe7   :  { %1494 = vmatmul.mubr.msk.f32.gmra.mxu0 %vm152_vm6, %v2002_v17 }
  0xe8   :  { %874 = vmatprep.mubr.f32.mxu0 %v2003_v43 }
  0xea   :  { %v185_v40 = vpop.permute.xlu1 %184 }
  0xeb   :  { %vm188_vm7 = vcmp.eq.s32.totalorder %v185_v40, %v2109_v14  ;;  %v752_v14 = vld [vmem:[#allocation4 + $0x2d8] sm:$0xff]  ;;  %v661_v40 = vld [vmem:[#allocation4] sm:$0xff] }
  0xec   :  { %1500 = vmatmul.mubr.msk.f32.gmra.mxu1 %vm188_vm7, %v2002_v17  ;;  %v754_v17 = vld [vmem:[#allocation4 + $0x2e8] sm:$0xff]  ;;  %815 = vmatpush1.msra.mxu0 %v752_v14 }
  0xed   :  { %898 = vmatpush1.msra.mxu1 %v754_v17  ;;  %816 = vmatprep.subr.mxu0 %v746_v51 }
  0xee   :  { %899 = vmatprep.subr.mxu1 %v748_v52  ;;  %817 = vmatpush1.msra.mxu0 %v745_v53 }
  0xef   :  { %900 = vmatpush1.msra.mxu1 %v747_v54  ;;  %818 = vmatprep.subr.mxu0 %v739_v55 }
  0xf0   :  { %901 = vmatprep.subr.mxu1 %v741_v56  ;;  %819 = vmatpush1.msra.mxu0 %v738_v57 }
  0xf1   :  { %902 = vmatpush1.msra.mxu1 %v740_v58  ;;  %820 = vmatprep.subr.mxu0 %v732_v59 }
  0xf2   :  { %903 = vmatprep.subr.mxu1 %v734_v60  ;;  %821 = vmatpush1.msra.mxu0 %v731_v61 }
  0xf3   :  { %904 = vmatpush1.msra.mxu1 %v733_v62  ;;  %822 = vmatprep.subr.mxu0 %v725_v63 }
  0xf4   :  { %905 = vmatprep.subr.mxu1 %v727_v0  ;;  %823 = vmatpush1.msra.mxu0 %v724_v1 }
  0xf5   :  { %906 = vmatpush1.msra.mxu1 %v726_v3  ;;  %824 = vmatprep.subr.mxu0 %v718_v4  ;;  %v770_v3 = vld [vmem:[#allocation4 + $0x368] sm:$0xff]  ;;  %v772_v4 = vld [vmem:[#allocation4 + $0x378] sm:$0xff] }
  0xf6   :  { %907 = vmatprep.subr.mxu1 %v720_v5  ;;  %825 = vmatpush1.msra.mxu0 %v717_v6  ;;  %v764_v5 = vld [vmem:[#allocation4 + $0x338] sm:$0xff] }
  0xf7   :  { %908 = vmatpush1.msra.mxu1 %v719_v7  ;;  %826 = vmatprep.subr.mxu0 %v711_v8  ;;  %v763_v7 = vld [vmem:[#allocation4 + $0x330] sm:$0xff]  ;;  %v765_v8 = vld [vmem:[#allocation4 + $0x340] sm:$0xff] }
  0xf8   :  { %909 = vmatprep.subr.mxu1 %v713_v9  ;;  %827 = vmatpush1.msra.mxu0 %v710_v10  ;;  %v757_v10 = vld [vmem:[#allocation4 + $0x300] sm:$0xff] }
  0xf9   :  { %910 = vmatpush1.msra.mxu1 %v712_v11  ;;  %828 = vmatprep.subr.mxu0 %v704_v12  ;;  %v756_v11 = vld [vmem:[#allocation4 + $0x2f8] sm:$0xff]  ;;  %v758_v12 = vld [vmem:[#allocation4 + $0x308] sm:$0xff] }
  0xfa   :  { %911 = vmatprep.subr.mxu1 %v706_v13  ;;  %829 = vmatpush1.msra.mxu0 %v703_v15 }
  0xfb   :  { %912 = vmatpush1.msra.mxu1 %v705_v16  ;;  %830 = vmatprep.subr.mxu0 %v697_v18  ;;  %v750_v18 = vld [vmem:[#allocation4 + $0x2c8] sm:$0xff] }
  0xfc   :  { %913 = vmatprep.subr.mxu1 %v699_v19  ;;  %831 = vmatpush1.msra.mxu0 %v696_v20  ;;  %v749_v19 = vld [vmem:[#allocation4 + $0x2c0] sm:$0xff]  ;;  %v751_v20 = vld [vmem:[#allocation4 + $0x2d0] sm:$0xff] }
  0xfd   :  { %914 = vmatpush1.msra.mxu1 %v698_v21  ;;  %832 = vmatprep.subr.mxu0 %v690_v22 }
  0xfe   :  { %915 = vmatprep.subr.mxu1 %v692_v23  ;;  %833 = vmatpush1.msra.mxu0 %v689_v24  ;;  %v743_v23 = vld [vmem:[#allocation4 + $0x290] sm:$0xff] }
  0xff   :  { %916 = vmatpush1.msra.mxu1 %v691_v25  ;;  %834 = vmatprep.subr.mxu0 %v683_v26  ;;  %v742_v25 = vld [vmem:[#allocation4 + $0x288] sm:$0xff]  ;;  %v744_v26 = vld [vmem:[#allocation4 + $0x298] sm:$0xff] }
 0x100   :  { %917 = vmatprep.subr.mxu1 %v685_v27  ;;  %835 = vmatpush1.msra.mxu0 %v682_v28  ;;  %v736_v28 = vld [vmem:[#allocation4 + $0x258] sm:$0xff] }
 0x101   :  { %918 = vmatpush1.msra.mxu1 %v684_v29  ;;  %836 = vmatprep.subr.mxu0 %v676_v30  ;;  %v735_v30 = vld [vmem:[#allocation4 + $0x250] sm:$0xff] }
 0x102   :  { %919 = vmatprep.subr.mxu1 %v678_v31  ;;  %837 = vmatpush1.msra.mxu0 %v675_v32  ;;  %v737_v31 = vld [vmem:[#allocation4 + $0x260] sm:$0xff] }
 0x103   :  { %920 = vmatpush1.msra.mxu1 %v677_v33  ;;  %838 = vmatprep.subr.mxu0 %v669_v34  ;;  %v729_v32 = vld [vmem:[#allocation4 + $0x220] sm:$0xff]  ;;  %v728_v33 = vld [vmem:[#allocation4 + $0x218] sm:$0xff]  ;;  %v730_v34 = vld [vmem:[#allocation4 + $0x228] sm:$0xff] }
 0x104   :  { %921 = vmatprep.subr.mxu1 %v671_v35  ;;  %839 = vmatpush1.msra.mxu0 %v668_v36  ;;  %v722_v36 = vld [vmem:[#allocation4 + $0x1e8] sm:$0xff] }
 0x105   :  { %922 = vmatpush1.msra.mxu1 %v670_v37  ;;  %840 = vmatprep.subr.mxu0 %v662_v38  ;;  %v721_v37 = vld [vmem:[#allocation4 + $0x1e0] sm:$0xff]  ;;  %v723_v38 = vld [vmem:[#allocation4 + $0x1f0] sm:$0xff] }
 0x106   :  { %923 = vmatprep.subr.mxu1 %v664_v39  ;;  %841 = vmatpush1.msra.mxu0 %v661_v40  ;;  %v715_v39 = vld [vmem:[#allocation4 + $0x1b0] sm:$0xff] }
 0x107   :  { %924 = vmatpush1.msra.mxu1 %v663_v41  ;;  %957 = vmatprep.mubr.f32.mxu1 %v2003_v43  ;;  %v714_v41 = vld [vmem:[#allocation4 + $0x1a8] sm:$0xff] }
 0x108   :  { %976 = vmatprep.subr.mxu0 %v771_v42  ;;  %1736 = vmatprep.subr.mxu1 %v2003_v43  ;;  %v716_v42 = vld [vmem:[#allocation4 + $0x1b8] sm:$0xff] }
 0x16b   :  { %v1534_v44 = vpop.f32.mrf.mxu0  ;;  %v1575_v47 = vpop.f32.mrf.mxu1 }
 0x16d   :  { %v1535_v45 = vpop.f32.mrf.mxu0  ;;  %v1576_v49 = vpop.f32.mrf.mxu1 }
 0x16e   :  { %v1536_v55 = vadd.f32 %v1535_v45, %v1534_v44  ;;  %v1577_v56 = vadd.f32 %v1576_v49, %v1575_v47  ;;  %v708_v45 = vld [vmem:[#allocation4 + $0x178] sm:$0xff]  ;;  %v707_v47 = vld [vmem:[#allocation4 + $0x170] sm:$0xff] }
 0x170   :  { %v488_v60 = vadd.f32 %v1577_v56, %v1536_v55 }
 0x171   :  { %v1537_v46 = vpop.f32.mrf.mxu0 }
 0x173   :  { %v1538_v48 = vpop.f32.mrf.mxu0 }
 0x174   :  { %v1539_v13 = vadd.f32 %v1538_v48, %v1537_v46  ;;  %v709_v48 = vld [vmem:[#allocation4 + $0x180] sm:$0xff] }
 0x176   :  { %v1578_v14 = vpop.f32.mrf.mxu1 }
 0x178   :  { %v1579_v51 = vpop.f32.mrf.mxu1 }
 0x179   :  { %v1580_v9 = vadd.f32 %v1579_v51, %v1578_v14  ;;  %v701_v51 = vld [vmem:[#allocation4 + $0x140] sm:$0xff] }
 0x17b   :  { %v493_v21 = vadd.f32 %v1580_v9, %v1539_v13  ;;  %v667_v9 = vld [vmem:[#allocation4 + $0x30] sm:$0xff]  ;;  %v1190_v13 = vld [vmem:[#allocation6 + $0x60] sm:$0xff] }
 0x17f   :  { %v2162_v50 = vpop.f32.mrf.mxu0 }
 0x181   :  { %v2164_v17 = vpop.f32.mrf.mxu0 }
 0x182   :  { %v1542_v49 = vadd.f32 %v2164_v17, %v2162_v50  ;;  %v695_v50 = vld [vmem:[#allocation4 + $0x110] sm:$0xff] }
 0x184   :  { %v2166_v53 = vpop.f32.mrf.mxu1 }
 0x186   :  { %v2168_v57 = vpop.f32.mrf.mxu1 }
 0x187   :  { %v1583_v44 = vadd.f32 %v2168_v57, %v2166_v53  ;;  %v700_v53 = vld [vmem:[#allocation4 + $0x138] sm:$0xff]  ;;  %v694_v57 = vld [vmem:[#allocation4 + $0x108] sm:$0xff] }
 0x189   :  { %v498_v55 = vadd.f32 %v1583_v44, %v1542_v49  ;;  %v776_v44 = vshrl.u32 %v64_v2, 7  ;;  %v773_v49 = vld [vmem:[%s2328_s3] sm:$0xff] }
 0x18b   :  { %v1616_v52 = vpop.f32.mrf.mxu0 }
 0x18d   :  { %v1617_v54 = vpop.f32.mrf.mxu0 }
 0x18e   :  { %v1618_v58 = vadd.f32 %v1617_v54, %v1616_v52  ;;  %v702_v54 = vld [vmem:[#allocation4 + $0x148] sm:$0xff] }
 0x190   :  { %v568_v62 = vadd.f32 %v1618_v58, %v488_v60  ;;  %v693_v58 = vld [vmem:[#allocation4 + $0x100] sm:$0xff] }
 0x194   :  { %v1657_v59 = vpop.f32.mrf.mxu1 }
 0x196   :  { %v1658_v61 = vpop.f32.mrf.mxu1 }
 0x197   :  { %v1659_v63 = vadd.f32 %v1658_v61, %v1657_v59  ;;  %v687_v59 = vld [vmem:[#allocation4 + $0xd0] sm:$0xff]  ;;  %v686_v61 = vld [vmem:[#allocation4 + $0xc8] sm:$0xff] }
 0x198   :  { %v1619_v0 = vpop.f32.mrf.mxu0 }
 0x199   :  { %v2170_v1 = vadd.f32 %v1659_v63, %v568_v62  ;;  %v688_v62 = vld [vmem:[#allocation4 + $0xd8] sm:$0xff] }
 0x19a   :  { %v1620_v6 = vpop.f32.mrf.mxu0  ;;  %v680_v63 = vld [vmem:[#allocation4 + $0x98] sm:$0xff] }
 0x19b   :  { %875 = vmatmul.mubr.f32.vlgmr.msra.gmra.mxu0 %v2170_v1  ;;  %958 = vmatmul.mubr.f32.vlgmr.msra.gmra.mxu1 %v2170_v1  ;;  %v1621_v15 = vadd.f32 %v1620_v6, %v1619_v0  ;;  %v679_v0 = vld [vmem:[#allocation4 + $0x90] sm:$0xff]  ;;  %v674_v6 = vld [vmem:[#allocation4 + $0x68] sm:$0xff] }
 0x19c   :  { %977 = vmatpush1.msra.mxu0 %v770_v3  ;;  %1737 = vmatpush3.msra.mxu1 %v772_v4  ;;  %v681_v3 = vld [vmem:[#allocation4 + $0xa0] sm:$0xff] }
 0x19d   :  { %978 = vmatprep.subr.mxu0 %v764_v5  ;;  %1738 = vmatprep.subr.mxu1 %v2003_v43  ;;  %v573_v27 = vadd.f32 %v1621_v15, %v493_v21  ;;  %v673_v4 = vld [vmem:[#allocation4 + $0x60] sm:$0xff]  ;;  %v672_v5 = vld [vmem:[#allocation4 + $0x58] sm:$0xff]  ;;  %v1208_v15 = vld [vmem:[#allocation6 + $0xf0] sm:$0xff] }
 0x19e   :  { %979 = vmatpush1.msra.mxu0 %v763_v7  ;;  %1739 = vmatpush3.msra.mxu1 %v765_v8  ;;  %v1660_v16 = vpop.f32.mrf.mxu1  ;;  %v666_v7 = vld [vmem:[#allocation4 + $0x28] sm:$0xff]  ;;  %v665_v8 = vld [vmem:[#allocation4 + $0x20] sm:$0xff] }
 0x19f   :  { %980 = vmatprep.subr.mxu0 %v757_v10  ;;  %1740 = vmatprep.subr.mxu1 %v2003_v43  ;;  %v1192_v10 = vld [vmem:[#allocation6 + $0x70] sm:$0xff]  ;;  %v1187_v21 = vld [vmem:[#allocation6 + $0x48] sm:$0xff] }
 0x1a0   :  { %981 = vmatpush1.msra.mxu0 %v756_v11  ;;  %1741 = vmatpush3.msra.mxu1 %v758_v12  ;;  %v1661_v22 = vpop.f32.mrf.mxu1  ;;  %v1191_v11 = vld [vmem:[#allocation6 + $0x68] sm:$0xff]  ;;  %v1209_v12 = vld [vmem:[#allocation6 + $0xf8] sm:$0xff] }
 0x1a1   :  { %982 = vmatprep.subr.mxu0 %v750_v18  ;;  %1742 = vmatprep.subr.mxu1 %v2003_v43  ;;  %v1662_v24 = vadd.f32 %v1661_v22, %v1660_v16  ;;  %v1189_v16 = vld [vmem:[#allocation6 + $0x58] sm:$0xff]  ;;  %v1207_v18 = vld [vmem:[#allocation6 + $0xe8] sm:$0xff] }
 0x1a2   :  { %983 = vmatpush1.msra.mxu0 %v749_v19  ;;  %1743 = vmatpush3.msra.mxu1 %v751_v20  ;;  %v1188_v19 = vld [vmem:[#allocation6 + $0x50] sm:$0xff]  ;;  %v1206_v20 = vld [vmem:[#allocation6 + $0xe0] sm:$0xff]  ;;  %v1205_v22 = vld [vmem:[#allocation6 + $0xd8] sm:$0xff] }
 0x1a3   :  { %984 = vmatprep.subr.mxu0 %v743_v23  ;;  %1744 = vmatprep.subr.mxu1 %v2003_v43  ;;  %v2178_v29 = vadd.f32 %v1662_v24, %v573_v27  ;;  %v1186_v23 = vld [vmem:[#allocation6 + $0x40] sm:$0xff]  ;;  %v1204_v24 = vld [vmem:[#allocation6 + $0xd0] sm:$0xff] }
 0x1a4   :  { %985 = vmatpush1.msra.mxu0 %v742_v25  ;;  %1745 = vmatpush3.msra.mxu1 %v744_v26  ;;  %v1185_v25 = vld [vmem:[#allocation6 + $0x38] sm:$0xff]  ;;  %v1203_v26 = vld [vmem:[#allocation6 + $0xc8] sm:$0xff]  ;;  %v1184_v27 = vld [vmem:[#allocation6 + $0x30] sm:$0xff] }
 0x1a5   :  { %986 = vmatprep.subr.mxu0 %v736_v28  ;;  %1746 = vmatprep.subr.mxu1 %v2003_v43  ;;  %v1202_v28 = vld [vmem:[#allocation6 + $0xc0] sm:$0xff] }
 0x1a6   :  { %880 = vmatprep.mubr.f32.mxu0 %v2003_v43  ;;  %963 = vmatprep.mubr.f32.mxu1 %v2003_v43 }
 0x1a7   :  { %987 = vmatpush1.msra.mxu0 %v735_v30  ;;  %1747 = vmatpush3.msra.mxu1 %v737_v31  ;;  %v1622_v35 = vpop.f32.mrf.mxu0  ;;  %v1201_v30 = vld [vmem:[#allocation6 + $0xb8] sm:$0xff]  ;;  %v1182_v31 = vld [vmem:[#allocation6 + $0x20] sm:$0xff] }
 0x1a8   :  { %881 = vmatmul.mubr.f32.gmra.mxu0 %v2178_v29  ;;  %964 = vmatmul.mubr.f32.gmra.mxu1 %v2178_v29 }
 0x1a9   :  { %988 = vmatprep.subr.mxu0 %v729_v32  ;;  %1748 = vmatprep.subr.mxu1 %v2003_v43  ;;  %v1623_v40 = vpop.f32.mrf.mxu0  ;;  %v1200_v32 = vld [vmem:[#allocation6 + $0xb0] sm:$0xff] }
 0x1aa   :  { %989 = vmatpush1.msra.mxu0 %v728_v33  ;;  %1749 = vmatpush3.msra.mxu1 %v730_v34  ;;  %v1624_v14 = vadd.f32 %v1623_v40, %v1622_v35  ;;  %v1181_v33 = vld [vmem:[#allocation6 + $0x18] sm:$0xff]  ;;  %v1199_v34 = vld [vmem:[#allocation6 + $0xa8] sm:$0xff]  ;;  %v1180_v35 = vld [vmem:[#allocation6 + $0x10] sm:$0xff] }
 0x1ab   :  { %990 = vmatprep.subr.mxu0 %v722_v36  ;;  %1750 = vmatprep.subr.mxu1 %v2003_v43  ;;  %v1198_v36 = vld [vmem:[#allocation6 + $0xa0] sm:$0xff]  ;;  %v1196_v40 = vld [vmem:[#allocation6 + $0x90] sm:$0xff] }
 0x1ac   :  { %991 = vmatpush1.msra.mxu0 %v721_v37  ;;  %1751 = vmatpush3.msra.mxu1 %v723_v38  ;;  %v1663_v46 = vpop.f32.mrf.mxu1  ;;  %v578_v17 = vadd.f32 %v1624_v14, %v498_v55  ;;  %v1179_v37 = vld [vmem:[#allocation6 + $0x8] sm:$0xff]  ;;  %v1197_v38 = vld [vmem:[#allocation6 + $0x98] sm:$0xff] }
 0x1ad   :  { %992 = vmatprep.subr.mxu0 %v715_v39  ;;  %1752 = vmatprep.subr.mxu1 %v2003_v43  ;;  %v1178_v39 = vld [vmem:[#allocation6] sm:$0xff] }
 0x1ae   :  { %993 = vmatpush1.msra.mxu0 %v714_v41  ;;  %1753 = vmatpush3.msra.mxu1 %v716_v42  ;;  %v1664_v52 = vpop.f32.mrf.mxu1  ;;  %v1195_v41 = vld [vmem:[#allocation6 + $0x88] sm:$0xff]  ;;  %v1194_v42 = vld [vmem:[#allocation6 + $0x80] sm:$0xff] }
 0x1af   :  { %994 = vmatprep.subr.mxu0 %v708_v45  ;;  %1754 = vmatprep.subr.mxu1 %v2003_v43  ;;  %v1665_v56 = vadd.f32 %v1664_v52, %v1663_v46  ;;  %v781_v46 = vsub.s32 1, %v776_v44 }
 0x1b0   :  { %995 = vmatpush1.msra.mxu0 %v707_v47  ;;  %1755 = vmatpush3.msra.mxu1 %v709_v48  ;;  %v777_v47 = vsub.s32 0, %v776_v44 }
 0x1b1   :  { %996 = vmatprep.subr.mxu0 %v701_v51  ;;  %1756 = vmatprep.subr.mxu1 %v2003_v43  ;;  %v658_v60 = vadd.f32 %v1665_v56, %v578_v17  ;;  %v2255_v51 = vrot.slane %v773_v49, %v781_v46  ;;  %v789_v17 = vsub.s32 3, %v776_v44 }
 0x1b2   :  { %997 = vmatpush1.msra.mxu0 %v700_v53  ;;  %1757 = vmatpush3.msra.mxu1 %v702_v54  ;;  %v2257_v53 = vrot.slane %v773_v49, %v777_v47  ;;  %v785_v54 = vsub.s32 2, %v776_v44 }
 0x1b3   :  { %998 = vmatprep.subr.mxu0 %v694_v57  ;;  %1758 = vmatprep.subr.mxu1 %v2003_v43 }
 0x1b4   :  { %999 = vmatpush1.msra.mxu0 %v693_v58  ;;  %1759 = vmatpush3.msra.mxu1 %v695_v50  ;;  %v2261_v50 = vrot.slane %v773_v49, %v785_v54 }
 0x1b5   :  { %1000 = vmatprep.subr.mxu0 %v687_v59  ;;  %1760 = vmatprep.subr.mxu1 %v2003_v43 }
 0x1b6   :  { %886 = vmatprep.mubr.f32.mxu0 %v2003_v43  ;;  %969 = vmatprep.mubr.f32.mxu1 %v2003_v43 }
 0x1b7   :  { %1001 = vmatpush1.msra.mxu0 %v686_v61  ;;  %1761 = vmatpush3.msra.mxu1 %v688_v62 }
 0x1b8   :  { %887 = vmatmul.mubr.f32.gmra.mxu0 %v658_v60  ;;  %970 = vmatmul.mubr.f32.gmra.mxu1 %v658_v60 }
 0x1b9   :  { %1002 = vmatprep.subr.mxu0 %v680_v63  ;;  %1762 = vmatprep.subr.mxu1 %v2003_v43 }
 0x1ba   :  { %1003 = vmatpush1.msra.mxu0 %v679_v0  ;;  %1763 = vmatpush3.msra.mxu1 %v681_v3  ;;  %v2266_v3 = vrot.slane %v773_v49, %v789_v17 }
 0x1bb   :  { %1004 = vmatprep.subr.mxu0 %v673_v4  ;;  %1764 = vmatprep.subr.mxu1 %v2003_v43  ;;  %v793_v4 = vsub.s32 4, %v776_v44 }
 0x1bc   :  { %1005 = vmatpush1.msra.mxu0 %v672_v5  ;;  %1765 = vmatpush3.msra.mxu1 %v674_v6 }
 0x1bd   :  { %1006 = vmatprep.subr.mxu0 %v666_v7  ;;  %1766 = vmatprep.subr.mxu1 %v2003_v43 }
 0x1be   :  { %1007 = vmatpush1.msra.mxu0 %v665_v8  ;;  %1040 = vmatprep.mubr.f32.mxu0 %v2003_v43  ;;  %v801_v8 = vsub.s32 6, %v776_v44 }
 0x1bf   :  { %1767 = vmatpush3.msra.mxu1 %v667_v9  ;;  %1768 = vmatprep.mubr.msk.f32.mxu1 %vm2004_vm8, %v2003_v43 }
 0x1c0   :  { %1041 = vmatmul.mubr.f32.vlgmr.msra.gmra.mxu0 %v2170_v1  ;;  %1769 = vmatmul.mubr.f32.vlgmr.msra.gmra.mxu1 %v2170_v1  ;;  %v1193_v1 = vld [vmem:[#allocation6 + $0x78] sm:$0xff] }
 0x1c1   :  { %1046 = vmatprep.mubr.f32.mxu0 %v2003_v43  ;;  %1771 = vmatprep.mubr.msk.f32.mxu1 %vm2004_vm8, %v2003_v43 }
 0x1c2   :  { %1777 = vmatprep.subr.mxu0 %v2003_v43  ;;  %1812 = vmatprep.subr.mxu1 %v2003_v43 }
 0x1c3   :  { %1778 = vmatpush3.msra.mxu0 %v1193_v1  ;;  %1813 = vmatpush3.msra.mxu1 %v1209_v12  ;;  %v797_v1 = vsub.s32 5, %v776_v44 }
 0x1c4   :  { %1047 = vmatmul.mubr.f32.gmra.mxu0 %v2178_v29  ;;  %1772 = vmatmul.mubr.f32.gmra.mxu1 %v2178_v29  ;;  %v1183_v29 = vld [vmem:[#allocation6 + $0x28] sm:$0xff] }
 0x1c5   :  { %1052 = vmatprep.mubr.f32.mxu0 %v2003_v43  ;;  %1774 = vmatprep.mubr.msk.f32.mxu1 %vm2004_vm8, %v2003_v43 }
 0x1c6   :  { %1779 = vmatprep.subr.mxu0 %v2003_v43  ;;  %1814 = vmatprep.subr.mxu1 %v2003_v43 }
 0x1c7   :  { %1780 = vmatpush3.msra.mxu0 %v1192_v10  ;;  %1815 = vmatpush3.msra.mxu1 %v1208_v15  ;;  %v2274_v15 = vrot.slane %v773_v49, %v793_v4  ;;  %v1221_v4 = vld [vmem:[#allocation6 + $0x158] sm:$0xff] }
 0x1c8   :  { %1053 = vmatmul.mubr.f32.gmra.mxu0 %v658_v60  ;;  %1775 = vmatmul.mubr.f32.gmra.mxu1 %v658_v60 }
 0x1c9   :  { %1809 = vmatprep.mubr.msk.f32.mxu0 %vm2004_vm8, %v2003_v43  ;;  %1844 = vmatprep.mubr.msk.f32.mxu1 %vm2004_vm8, %v2003_v43 }
 0x1ca   :  { %1781 = vmatprep.subr.mxu0 %v2003_v43  ;;  %1816 = vmatprep.subr.mxu1 %v2003_v43 }
 0x1cb   :  { %1782 = vmatpush3.msra.mxu0 %v1191_v11  ;;  %1817 = vmatpush3.msra.mxu1 %v1207_v18 }
 0x1cc   :  { %1783 = vmatprep.subr.mxu0 %v2003_v43  ;;  %1818 = vmatprep.subr.mxu1 %v2003_v43 }
 0x1cd   :  { %1784 = vmatpush3.msra.mxu0 %v1190_v13  ;;  %1819 = vmatpush3.msra.mxu1 %v1206_v20  ;;  %v2278_v20 = vrot.slane %v773_v49, %v801_v8  ;;  %v1220_v8 = vld [vmem:[#allocation6 + $0x150] sm:$0xff] }
 0x1ce   :  { %1785 = vmatprep.subr.mxu0 %v2003_v43  ;;  %1820 = vmatprep.subr.mxu1 %v2003_v43 }
 0x1cf   :  { %1786 = vmatpush3.msra.mxu0 %v1189_v16  ;;  %1821 = vmatpush3.msra.mxu1 %v1205_v22  ;;  %v2280_v22 = vrot.slane %v773_v49, %v797_v1  ;;  %v1219_v1 = vld [vmem:[#allocation6 + $0x148] sm:$0xff] }
 0x1d0   :  { %1787 = vmatprep.subr.mxu0 %v2003_v43  ;;  %1822 = vmatprep.subr.mxu1 %v2003_v43 }
 0x1d1   :  { %1788 = vmatpush3.msra.mxu0 %v1188_v19  ;;  %1823 = vmatpush3.msra.mxu1 %v1204_v24 }
 0x1d2   :  { %1789 = vmatprep.subr.mxu0 %v2003_v43  ;;  %1824 = vmatprep.subr.mxu1 %v2003_v43 }
 0x1d3   :  { %1790 = vmatpush3.msra.mxu0 %v1187_v21  ;;  %1825 = vmatpush3.msra.mxu1 %v1203_v26 }
 0x1d4   :  { %1791 = vmatprep.subr.mxu0 %v2003_v43  ;;  %1826 = vmatprep.subr.mxu1 %v2003_v43 }
 0x1d5   :  { %1792 = vmatpush3.msra.mxu0 %v1186_v23  ;;  %1827 = vmatpush3.msra.mxu1 %v1202_v28 }
 0x1d6   :  { %1793 = vmatprep.subr.mxu0 %v2003_v43  ;;  %1828 = vmatprep.subr.mxu1 %v2003_v43 }
 0x1d7   :  { %1794 = vmatpush3.msra.mxu0 %v1185_v25  ;;  %1829 = vmatpush3.msra.mxu1 %v1201_v30 }
 0x1d8   :  { %1795 = vmatprep.subr.mxu0 %v2003_v43  ;;  %1830 = vmatprep.subr.mxu1 %v2003_v43 }
 0x1d9   :  { %1796 = vmatpush3.msra.mxu0 %v1184_v27  ;;  %1831 = vmatpush3.msra.mxu1 %v1200_v32 }
 0x1da   :  { %1797 = vmatprep.subr.mxu0 %v2003_v43  ;;  %1832 = vmatprep.subr.mxu1 %v2003_v43 }
 0x1db   :  { %1798 = vmatpush3.msra.mxu0 %v1183_v29  ;;  %1833 = vmatpush3.msra.mxu1 %v1199_v34 }
 0x1dc   :  { %1799 = vmatprep.subr.mxu0 %v2003_v43  ;;  %1834 = vmatprep.subr.mxu1 %v2003_v43 }
 0x1dd   :  { %1800 = vmatpush3.msra.mxu0 %v1182_v31  ;;  %1835 = vmatpush3.msra.mxu1 %v1198_v36 }
 0x1de   :  { %1801 = vmatprep.subr.mxu0 %v2003_v43  ;;  %1836 = vmatprep.subr.mxu1 %v2003_v43 }
 0x1df   :  { %1802 = vmatpush3.msra.mxu0 %v1181_v33  ;;  %1837 = vmatpush3.msra.mxu1 %v1197_v38 }
 0x1e0   :  { %1803 = vmatprep.subr.mxu0 %v2003_v43  ;;  %1838 = vmatprep.subr.mxu1 %v2003_v43 }
 0x1e1   :  { %1804 = vmatpush3.msra.mxu0 %v1180_v35  ;;  %1839 = vmatpush3.msra.mxu1 %v1196_v40 }
 0x1e2   :  { %1805 = vmatprep.subr.mxu0 %v2003_v43  ;;  %1840 = vmatprep.subr.mxu1 %v2003_v43 }
 0x1e3   :  { %1806 = vmatpush3.msra.mxu0 %v1179_v37  ;;  %1841 = vmatpush3.msra.mxu1 %v1195_v41 }
 0x1e4   :  { %1807 = vmatprep.subr.mxu0 %v2003_v43  ;;  %1842 = vmatprep.subr.mxu1 %v2003_v43 }
 0x1e5   :  { %1808 = vmatpush3.msra.mxu0 %v1178_v39  ;;  %1843 = vmatpush3.msra.mxu1 %v1194_v42 }
 0x1e6   :  { %1847 = vmatprep.subr.mxu0 %v2003_v43 }
 0x25b   :  { %v876_v45 = vpop.f32.mrf.mxu0  ;;  %v959_v14 = vpop.f32.mrf.mxu1 }
 0x25c   :  { %v877_v58 = vadd.f32 %v876_v45, %v2257_v53  ;;  %v960_v0 = vadd.f32 %v959_v14, %v2261_v50 }
 0x25d   :  { %v878_v48 = vpop.f32.mrf.mxu0  ;;  %v961_v55 = vpop.f32.mrf.mxu1 }
 0x25e   :  { %v879_v56 = vadd.f32 %v878_v48, %v2255_v51  ;;  %v1139_v63 = vmax.f32 %v877_v58, 0.0  ;;  %v1141_v12 = vmax.f32 %v960_v0, 0.0  ;;  %v962_v13 = vadd.f32 %v961_v55, %v2266_v3 }
 0x260   :  { %v1140_v60 = vmax.f32 %v879_v56, 0.0  ;;  %v1142_v27 = vmax.f32 %v962_v13, 0.0 }
 0x262   :  { %v1160_v9 = vmax.f32 %v1139_v63, %v1140_v60  ;;  %v1222_v63 = vld [vmem:[#allocation6 + $0x160] sm:$0xff] }
 0x264   :  { %v1163_v21 = vmax.f32 %v1160_v9, %v1141_v12 }
 0x266   :  { %v1166_v33 = vmax.f32 %v1163_v21, %v1142_v27  ;;  %v1213_v27 = vld [vmem:[#allocation6 + $0x118] sm:$0xff] }
 0x268   :  { %v882_v52 = vpop.f32.mrf.mxu0  ;;  %v965_v2 = vpop.f32.mrf.mxu1 }
 0x269   :  { %v883_v61 = vadd.f32 %v882_v52, %v2257_v53  ;;  %v966_v11 = vadd.f32 %v965_v2, %v2261_v50 }
 0x26a   :  { %v884_v57 = vpop.f32.mrf.mxu0  ;;  %v967_v62 = vpop.f32.mrf.mxu1 }
 0x26b   :  { %v885_v59 = vadd.f32 %v884_v57, %v2255_v51  ;;  %v1146_v10 = vmax.f32 %v883_v61, 0.0  ;;  %v1148_v23 = vmax.f32 %v966_v11, 0.0  ;;  %v968_v24 = vadd.f32 %v967_v62, %v2266_v3  ;;  %v1225_v57 = vld [vmem:[#allocation6 + $0x178] sm:$0xff]  ;;  %v1223_v61 = vld [vmem:[#allocation6 + $0x168] sm:$0xff] }
 0x26d   :  { %v1147_v5 = vmax.f32 %v885_v59, 0.0  ;;  %v1149_v36 = vmax.f32 %v968_v24, 0.0  ;;  %v1224_v59 = vld [vmem:[#allocation6 + $0x170] sm:$0xff] }
 0x26f   :  { %v1161_v16 = vmax.f32 %v1146_v10, %v1147_v5 }
 0x271   :  { %v1164_v29 = vmax.f32 %v1161_v16, %v1148_v23  ;;  %v1217_v16 = vld [vmem:[#allocation6 + $0x138] sm:$0xff] }
 0x273   :  { %v1167_v42 = vmax.f32 %v1164_v29, %v1149_v36 }
 0x278   :  { %v2268_v6 = vpop.f32.mrf.mxu0  ;;  %v2270_v7 = vpop.f32.mrf.mxu1 }
 0x279   :  { %v889_v0 = vadd.f32 %v2268_v6, %v2257_v53  ;;  %v1218_v53 = vld [vmem:[#allocation6 + $0x140] sm:$0xff] }
 0x27a   :  { %v890_v18 = vpop.f32.mrf.mxu0  ;;  %v2276_v19 = vpop.f32.mrf.mxu1 }
 0x27b   :  { %v891_v62 = vadd.f32 %v890_v18, %v2255_v51  ;;  %v1153_v9 = vmax.f32 %v889_v0, 0.0  ;;  %v972_v51 = vadd.f32 %v2270_v7, %v2261_v50  ;;  %v974_v12 = vadd.f32 %v2276_v19, %v2266_v3  ;;  %v1216_v18 = vld [vmem:[#allocation6 + $0x130] sm:$0xff] }
 0x27d   :  { %v1154_v5 = vmax.f32 %v891_v62, 0.0  ;;  %v1155_v6 = vmax.f32 %v972_v51, 0.0  ;;  %v1156_v21 = vmax.f32 %v974_v12, 0.0 }
 0x27f   :  { %v1162_v11 = vmax.f32 %v1153_v9, %v1154_v5 }
 0x280   :  { %v1042_v25 = vpop.f32.mrf.mxu0  ;;  %v1125_v26 = vpop.f32.mrf.mxu1 }
 0x281   :  { %v1043_v28 = vadd.f32 %v1042_v25, %v2274_v15  ;;  %v1126_v30 = vadd.f32 %v1125_v26, %v2278_v20  ;;  %v1165_v7 = vmax.f32 %v1162_v11, %v1155_v6  ;;  %v1215_v25 = vld [vmem:[#allocation6 + $0x128] sm:$0xff] }
 0x282   :  { %v1044_v31 = vpop.f32.mrf.mxu0  ;;  %v1770_v32 = vpop.f32.mrf.mxu1 }
 0x283   :  { %v1143_v34 = vmax.f32 %v1043_v28, 0.0  ;;  %v1045_v35 = vadd.f32 %v1044_v31, %v2280_v22  ;;  %v1145_v44 = vmax.f32 %v1126_v30, 0.0  ;;  %v1168_v3 = vmax.f32 %v1165_v7, %v1156_v21  ;;  %v1211_v30 = vld [vmem:[#allocation6 + $0x108] sm:$0xff]  ;;  %v1210_v32 = vld [vmem:[#allocation6 + $0x100] sm:$0xff] }
 0x284   :  { %v1048_v37 = vpop.f32.mrf.mxu0  ;;  %v1130_v38 = vpop.f32.mrf.mxu1 }
 0x285   :  { %v1169_v39 = vmax.f32 %v1166_v33, %v1143_v34  ;;  %v1144_v40 = vmax.f32 %v1045_v35, 0.0  ;;  %v1049_v41 = vadd.f32 %v1048_v37, %v2274_v15  ;;  %v1131_v49 = vadd.f32 %v1130_v38, %v2278_v20 }
 0x286   :  { %v1050_v45 = vpop.f32.mrf.mxu0  ;;  %v1773_v46 = vpop.f32.mrf.mxu1 }
 0x287   :  { %v1172_v47 = vmax.f32 %v1169_v39, %v1144_v40  ;;  %v1150_v48 = vmax.f32 %v1049_v41, 0.0  ;;  %v1051_v14 = vadd.f32 %v1050_v45, %v2280_v22  ;;  %v1152_v58 = vmax.f32 %v1131_v49, 0.0  ;;  %v1501_v39 = vld [vmem:[%s2330_s5] ss:$0 sm:$0xff] }
 0x288   :  { %v2289_v52 = vpop.f32.mrf.mxu1  ;;  %v1054_v10 = vpop.f32.mrf.mxu0 }
 0x289   :  { %v1175_v54 = vmax.f32 %v1172_v47, %v1145_v44  ;;  %v1170_v55 = vmax.f32 %v1167_v42, %v1150_v48  ;;  %v1151_v56 = vmax.f32 %v1051_v14, 0.0  ;;  %v1055_v13 = vadd.f32 %v1054_v10, %v2274_v15  ;;  %v1214_v15 = vld [vmem:[#allocation6 + $0x120] sm:$0xff] }
 0x28a   :  { %v1776_v2 = vpop.f32.mrf.mxu1  ;;  %v1056_v50 = vpop.f32.mrf.mxu0  ;;  %v1136_v28 = vadd.f32 %v2289_v52, %v2278_v20 }
 0x28b   :  { %v1173_v17 = vmax.f32 %v1170_v55, %v1151_v56  ;;  %1810 = vmatmul.mubr.f32.vlgmr.msra.gmra.mxu0 %v1175_v54  ;;  %v1157_v23 = vmax.f32 %v1055_v13, 0.0  ;;  %v1057_v24 = vadd.f32 %v1056_v50, %v2280_v22  ;;  %v1212_v22 = vld [vmem:[#allocation6 + $0x110] sm:$0xff] }
 0x28c   :  { %1848 = vmatpush3.msra.mxu0 %v1225_v57  ;;  %1879 = vmatprep.mubr.msk.f32.mxu0 %vm2004_vm8, %v2003_v43  ;;  %v1159_v31 = vmax.f32 %v1136_v28, 0.0 }
 0x28d   :  { %v1176_v60 = vmax.f32 %v1173_v17, %v1152_v58  ;;  %1849 = vmatprep.subr.mxu0 %v2003_v43  ;;  %v1171_v19 = vmax.f32 %v1168_v3, %v1157_v23  ;;  %v1158_v26 = vmax.f32 %v1057_v24, 0.0 }
 0x28e   :  { %1850 = vmatpush3.msra.mxu0 %v1224_v59 }
 0x28f   :  { %1851 = vmatprep.subr.mxu0 %v2003_v43  ;;  %1845 = vmatmul.mubr.f32.vlgmr.msra.gmra.mxu1 %v1176_v60  ;;  %v1174_v29 = vmax.f32 %v1171_v19, %v1158_v26 }
 0x290   :  { %1852 = vmatpush3.msra.mxu0 %v1223_v61 }
 0x291   :  { %1853 = vmatprep.subr.mxu0 %v2003_v43  ;;  %v1177_v33 = vmax.f32 %v1174_v29, %v1159_v31 }
 0x292   :  { %1854 = vmatpush3.msra.mxu0 %v1222_v63 }
 0x293   :  { %1855 = vmatprep.subr.mxu0 %v2003_v43 }
 0x294   :  { %1856 = vmatpush3.msra.mxu0 %v1221_v4 }
 0x295   :  { %1857 = vmatprep.subr.mxu0 %v2003_v43 }
 0x296   :  { %1858 = vmatpush3.msra.mxu0 %v1220_v8 }
 0x297   :  { %1859 = vmatprep.subr.mxu0 %v2003_v43 }
 0x298   :  { %1860 = vmatpush3.msra.mxu0 %v1219_v1 }
 0x299   :  { %1861 = vmatprep.subr.mxu0 %v2003_v43 }
 0x29a   :  { %1862 = vmatpush3.msra.mxu0 %v1218_v53 }
 0x29b   :  { %1863 = vmatprep.subr.mxu0 %v2003_v43 }
 0x29c   :  { %1864 = vmatpush3.msra.mxu0 %v1217_v16 }
 0x29d   :  { %1865 = vmatprep.subr.mxu0 %v2003_v43 }
 0x29e   :  { %1866 = vmatpush3.msra.mxu0 %v1216_v18 }
 0x29f   :  { %1867 = vmatprep.subr.mxu0 %v2003_v43 }
 0x2a0   :  { %1868 = vmatpush3.msra.mxu0 %v1215_v25 }
 0x2a1   :  { %1869 = vmatprep.subr.mxu0 %v2003_v43 }
 0x2a2   :  { %1870 = vmatpush3.msra.mxu0 %v1214_v15 }
 0x2a3   :  { %1871 = vmatprep.subr.mxu0 %v2003_v43 }
 0x2a4   :  { %1872 = vmatpush3.msra.mxu0 %v1213_v27 }
 0x2a5   :  { %1873 = vmatprep.subr.mxu0 %v2003_v43 }
 0x2a6   :  { %1874 = vmatpush3.msra.mxu0 %v1212_v22 }
 0x2a7   :  { %1875 = vmatprep.subr.mxu0 %v2003_v43 }
 0x2a8   :  { %1876 = vmatpush3.msra.mxu0 %v1211_v30 }
 0x2a9   :  { %1877 = vmatprep.subr.mxu0 %v2003_v43 }
 0x2aa   :  { %1878 = vmatpush3.msra.mxu0 %v1210_v32 }
 0x2ab   :  { %1880 = vmatmul.mubr.f32.vlgmr.msra.gmra.mxu0 %v1177_v33 }
 0x34b   :  { %v1292_v20 = vpop.f32.mrf.mxu0 }
 0x34d   :  { %v1811_v34 = vpop.f32.mrf.mxu0 }
 0x34f   :  { %v1362_v35 = vpop.f32.mrf.mxu1 }
 0x350   :  { %v1436_v37 = vadd.f32 %v1362_v35, %v1292_v20 }
 0x351   :  { %v1846_v36 = vpop.f32.mrf.mxu1 }
 0x36b   :  { %v1432_v38 = vpop.f32.mrf.mxu0 }
 0x36c   :  { %v1437_v40 = vadd.f32 %v1436_v37, %v1432_v38 }
 0x36d   :  { %v1881_v41 = vpop.f32.mrf.mxu0 }
 0x36e   :  { %v1445_v42 = vadd.f32 %v1501_v39, %v1437_v40 }
 0x370   :  { %1446 = vst [vmem:[%s2331_s6] sm:$0xff] %v1445_v42 }
 0x371   :  { %1451 = vsyncpa [#allocation3], 1 }
 0x372   :  { %1452 = vsyncpa [#allocation5], 1 }

</bundles_post_ra>
